<compile_context>
chip_gen: v5e
topology: v5e:2x2
jax: 0.10.0
libtpu: 0.0.40
codegen_flags: <defaults>
</compile_context>

<pallas_src>
import functools

import jax
import jax.numpy as jnp
from jax.experimental import pallas as pl
from jax.experimental.pallas import tpu as pltpu

NEG_SLOPE = 0.2     # GATConv default negative_slope
BN_EPS = 1e-5       # BatchNorm default eps
MASK_NEG = -1e30    # additive mask bias for non-edges


def _gat_bn_relu(xin, eattr_ref, mask_bias, w_ref, acat_ref, we_ref,
                 bias_ref, gamma_ref, beta_ref, *, heads, out_ch, edge_dim):
    """One GATConv + BatchNorm + ReLU layer, fully VMEM/vreg-resident."""
    n = xin.shape[0]

    # node linear transform (MXU, bf16 operands, f32 accumulation)
    h = jnp.dot(xin.astype(jnp.bfloat16), w_ref[...],
                preferred_element_type=jnp.float32)                  # (N, H*C) f32

    # fused per-head attention scalars for dst AND src in ONE matmul:
    #   a[:, :H] = a_dst, a[:, H:] = a_src
    a = jnp.dot(h.astype(jnp.bfloat16), acat_ref[...],
                preferred_element_type=jnp.float32)                  # (N, 2H) f32
    # hoist the sublane->lane move out of the head loop: one small transpose / layer
    a_src_t = jnp.transpose(a[:, heads:], (1, 0))                    # (H, N)

    ones_col = jnp.ones((n, 1), jnp.bfloat16)
    head_outs = []
    for hd in range(heads):
        # additive bias: edge-attr contribution (edge_dim scaled adds) + mask bias
        ae = mask_bias                                               # (N, N) f32
        for e in range(edge_dim):
            ae = ae + we_ref[e, hd] * eattr_ref[e]                   # f32 scalar * bf16 -> f32

        logits = a[:, hd:hd + 1] + a_src_t[hd:hd + 1, :] + ae        # (N, N)
        logits = jnp.where(logits >= 0, logits, NEG_SLOPE * logits)  # LeakyReLU
        m = jnp.max(logits, axis=-1, keepdims=True)
        p = jnp.exp(logits - m)                                      # un-normalized weights

        # softmax denominator folded into the aggregation matmul:
        #   dot(p, [h_head | 1]) -> (N, C+1); last column = row-sum of p
        hh_aug = jnp.concatenate(
            [h[:, hd * out_ch:(hd + 1) * out_ch].astype(jnp.bfloat16), ones_col],
            axis=-1)                                                 # (N, C+1) bf16
        agg = jnp.dot(p.astype(jnp.bfloat16), hh_aug,
                      preferred_element_type=jnp.float32)            # (N, C+1) f32
        inv = pl.reciprocal(agg[:, out_ch:out_ch + 1], approx=True)  # EUP
        head_outs.append(agg[:, :out_ch] * inv)                      # (N, C)

    # concat heads in registers; one wide slab, no masked partial VMEM stores
    slab = head_outs[0] if heads == 1 else jnp.concatenate(head_outs, axis=-1)
    slab = slab + bias_ref[...]                                      # (N, H*C)

    # BatchNorm over nodes (training-mode batch statistics, biased variance) + ReLU
    # TODO(synk): running_mean/var bookkeeping of BatchNorm is omitted (it does not
    # affect the training-mode forward output).
    mean = jnp.mean(slab, axis=0, keepdims=True)
    var = jnp.mean((slab - mean) ** 2, axis=0, keepdims=True)
    xhat = (slab - mean) * jax.lax.rsqrt(var + BN_EPS)
    return jnp.maximum(xhat * gamma_ref[...] + beta_ref[...], 0.0)


def gat_block_kernel(*refs, dims, edge_dim):
    """Fused conv1+BN1+ReLU -> conv2+BN2+ReLU -> conv3+BN3+ReLU in one pallas_call."""
    x_ref, eattr_ref, mask_ref = refs[0], refs[1], refs[2]
    out_ref = refs[-1]
    layer_refs = refs[3:-1]     # 6 refs/layer: W, A_cat, we_att(SMEM), bias, gamma, beta

    mask_bias = mask_ref[...]   # (N, N) f32, shared by all layers / heads
    y = x_ref[...]
    off = 0
    for heads, out_ch in dims:
        y = _gat_bn_relu(y, eattr_ref, mask_bias, *layer_refs[off:off + 6],
                         heads=heads, out_ch=out_ch, edge_dim=edge_dim)
        off += 6

    # TODO(synk): final store is only heads*out_ch (<128) lanes wide; batch several
    # graphs (mask bias already blocks cross-graph attention) for a lane-dense store
    # and better MXU fill on v6e/v7x.
    out_ref[...] = y


def run_gat_block(x, eattr_dense, mask_bias, layer_inputs, dims, edge_dim):
    """layer_inputs: list of 6-tuples (W_bf16, Acat_bf16, we_att, bias, gamma, beta)."""
    n = x.shape[0]
    out_dim = dims[-1][0] * dims[-1][1]

    vmem = pl.BlockSpec(memory_space=pltpu.MemorySpace.VMEM)
    smem = pl.BlockSpec(memory_space=pltpu.MemorySpace.SMEM)

    flat = [x, eattr_dense, mask_bias]
    specs = [vmem, vmem, vmem]
    for (w, acat, we, b, g, bt) in layer_inputs:
        flat += [w, acat, we, b, g, bt]
        specs += [vmem, vmem, smem, vmem, vmem, vmem]

    # size scoped VMEM from the actual buffers (defaults 16/32 MiB are far below
    # physical); cap below v7x's 64 MiB physical VMEM.
    in_bytes = sum(int(a.size) * a.dtype.itemsize for a in flat)
    out_bytes = n * out_dim * 4
    vmem_limit = int(min(max(2 * (in_bytes + out_bytes) + (8 << 20), 32 << 20), 64 << 20))

    kernel = functools.partial(gat_block_kernel, dims=tuple(dims), edge_dim=edge_dim)
    # TODO(synk): for large graphs, tile the dst-node axis with a grid
    # (dimension_semantics=("parallel",) for the second v7x TensorCore), stage the
    # (edge_dim, N, N) slab from HBM with double-buffered make_async_copy, and do
    # BatchNorm in two passes (partial sum / sum-sq finalized at the last step).
    return pl.pallas_call(
        kernel,
        out_shape=jax.ShapeDtypeStruct((n, out_dim), jnp.float32),
        in_specs=specs,
        out_specs=vmem,
        compiler_params=pltpu.CompilerParams(vmem_limit_bytes=vmem_limit),
    )(*flat)


# ----------------------------- host-side (one-time) prep ----------------------------

def init_gat_params(key, f_in, heads, out_ch, edge_dim):
    """Deterministic synthetic parameters matching PyG GATConv shapes."""
    k = jax.random.split(key, 6)
    w = jax.random.normal(k[0], (f_in, heads * out_ch), jnp.float32) * 0.2
    att_src = jax.random.normal(k[1], (heads, out_ch), jnp.float32) * 0.2
    att_dst = jax.random.normal(k[2], (heads, out_ch), jnp.float32) * 0.2
    w_edge = jax.random.normal(k[3], (edge_dim, heads * out_ch), jnp.float32) * 0.2
    att_edge = jax.random.normal(k[4], (heads, out_ch), jnp.float32) * 0.2
    bias = jax.random.normal(k[5], (1, heads * out_ch), jnp.float32) * 0.1
    # fold lin_edge with att_edge:
    #   alpha_edge = ((edge_attr @ W_edge).view(H, C) * att_edge).sum(C) = edge_attr @ we_att
    we_att = jnp.sum(w_edge.reshape(edge_dim, heads, out_ch) * att_edge[None], axis=-1)
    gamma = jnp.ones((1, heads * out_ch), jnp.float32)
    beta = jnp.zeros((1, heads * out_ch), jnp.float32)
    return dict(W=w, att_src=att_src, att_dst=att_dst, we_att=we_att, bias=bias,
                gamma=gamma, beta=beta, heads=heads, out_ch=out_ch)


def block_diag_att(att):
    """(H, C) attention vector -> (H*C, H) block-diagonal matrix so that
    (h @ A)[n, k] = sum_c h[n, k*C + c] * att[k, c]."""
    h, c = att.shape
    eye = jnp.eye(h, dtype=att.dtype)
    return (att[:, :, None] * eye[:, None, :]).reshape(h * c, h)


def densify_graph(edge_index, edge_attr, num_nodes):
    """Dense (edge_dim, N_dst, N_src) edge attrs + (N, N) adjacency mask with self
    loops (GATConv add_self_loops=True, fill_value='mean').
    Exact for graphs without duplicate (src, dst) edges."""
    src, dst = edge_index[0], edge_index[1]
    edge_dim = edge_attr.shape[1]
    mask = jnp.zeros((num_nodes, num_nodes), jnp.float32).at[dst, src].set(1.0)
    dense = jnp.zeros((num_nodes, num_nodes, edge_dim), jnp.float32).at[dst, src].set(edge_attr)
    # self-loop attr = mean of incoming edge attrs per destination node (0 if none)
    deg = jnp.zeros((num_nodes,), jnp.float32).at[dst].add(1.0)
    ssum = jnp.zeros((num_nodes, edge_dim), jnp.float32).at[dst].add(edge_attr)
    self_attr = ssum / jnp.maximum(deg, 1.0)[:, None]
    idx = jnp.arange(num_nodes)
    mask = mask.at[idx, idx].set(1.0)
    dense = dense.at[idx, idx].set(self_attr)
    return jnp.transpose(dense, (2, 0, 1)), mask   # (edge_dim, N_dst, N_src), (N, N)


def prepare_layer_inputs(params):
    """Per-layer constants:
       W (bf16), A_cat = [block_diag(att_dst) | block_diag(att_src)] (H*C, 2H) bf16,
       we_att (edge_dim, H) f32 (-> SMEM), bias/gamma/beta f32."""
    acat = jnp.concatenate([block_diag_att(params["att_dst"]),
                            block_diag_att(params["att_src"])], axis=1)
    return (params["W"].astype(jnp.bfloat16),
            acat.astype(jnp.bfloat16),
            params["we_att"],
            params["bias"], params["gamma"], params["beta"])


if __name__ == "__main__":
    key = jax.random.PRNGKey(0)

    # GATblock(num_feat, nheads, hidden_dim, output_dim, num_edges)
    # ("num_edges" is used as GATConv edge_dim, i.e. edge-feature dimension).
    num_nodes = 16
    num_feat = 8
    nheads = 2
    hidden_dim = 8
    output_dim = 8
    edge_dim = 4
    num_graph_edges = 40

    k_x, k_e, k_attr, k1, k2, k3 = jax.random.split(key, 6)

    x = jax.random.normal(k_x, (num_nodes, num_feat), jnp.float32)

    # deterministic random directed edges, no self loops, no duplicates
    pairs = jnp.array([(i, j) for i in range(num_nodes) for j in range(num_nodes) if i != j],
                      jnp.int32)
    perm = jax.random.permutation(k_e, pairs.shape[0])
    sel = pairs[perm[:num_graph_edges]]
    edge_index = jnp.stack([sel[:, 0], sel[:, 1]], axis=0)        # row0 = src, row1 = dst
    edge_weigth = jax.random.normal(k_attr, (num_graph_edges, edge_dim), jnp.float32)

    # parameters for conv1/conv2/conv3 (+ their BatchNorms)
    p1 = init_gat_params(k1, num_feat, nheads, hidden_dim, edge_dim)
    p2 = init_gat_params(k2, nheads * hidden_dim, nheads, output_dim, edge_dim)
    p3 = init_gat_params(k3, nheads * output_dim, 1, output_dim, edge_dim)  # heads=1 default

    # one-time host-side graph densification; the only O(N^2) inputs are the shared
    # (edge_dim, N, N) edge-attr tensor (bf16) and the (N, N) mask bias (f32).
    eattr_dense, mask = densify_graph(edge_index, edge_weigth, num_nodes)
    mask_neg_bias = (1.0 - mask) * MASK_NEG
    eattr_bf16 = eattr_dense.astype(jnp.bfloat16)

    layer_inputs = [prepare_layer_inputs(p) for p in (p1, p2, p3)]
    dims = [(p["heads"], p["out_ch"]) for p in (p1, p2, p3)]

    out = run_gat_block(x, eattr_bf16, mask_neg_bias, layer_inputs, dims, edge_dim)
    jax.block_until_ready(out)
    assert out.shape == (num_nodes, output_dim)
    print("KERNEL_OK")
</pallas_src>

<mosaic_0001>
module attributes {stable_mosaic.version = 11 : i64} {
  func.func @gat_block_kernel(%arg0: memref<16x8xf32, #tpu.memory_space<vmem>>, %arg1: memref<4x16x16xbf16, #tpu.memory_space<vmem>>, %arg2: memref<16x16xf32, #tpu.memory_space<vmem>>, %arg3: memref<8x16xbf16, #tpu.memory_space<vmem>>, %arg4: memref<16x4xbf16, #tpu.memory_space<vmem>>, %arg5: memref<4x2xf32, #tpu.memory_space<smem>>, %arg6: memref<1x16xf32, #tpu.memory_space<vmem>>, %arg7: memref<1x16xf32, #tpu.memory_space<vmem>>, %arg8: memref<1x16xf32, #tpu.memory_space<vmem>>, %arg9: memref<16x16xbf16, #tpu.memory_space<vmem>>, %arg10: memref<16x4xbf16, #tpu.memory_space<vmem>>, %arg11: memref<4x2xf32, #tpu.memory_space<smem>>, %arg12: memref<1x16xf32, #tpu.memory_space<vmem>>, %arg13: memref<1x16xf32, #tpu.memory_space<vmem>>, %arg14: memref<1x16xf32, #tpu.memory_space<vmem>>, %arg15: memref<16x8xbf16, #tpu.memory_space<vmem>>, %arg16: memref<8x2xbf16, #tpu.memory_space<vmem>>, %arg17: memref<4x1xf32, #tpu.memory_space<smem>>, %arg18: memref<1x8xf32, #tpu.memory_space<vmem>>, %arg19: memref<1x8xf32, #tpu.memory_space<vmem>>, %arg20: memref<1x8xf32, #tpu.memory_space<vmem>>, %arg21: memref<16x8xf32, #tpu.memory_space<vmem>>) attributes {dimension_semantics = [], scalar_prefetch = 0 : i64, scratch_operands = 0 : i64, tpu.core_type = #tpu.core_type<tc>} {
    %c0 = arith.constant 0 : index
    %c0_0 = arith.constant 0 : index
    %0 = vector.load %arg2[%c0, %c0_0] : memref<16x16xf32, #tpu.memory_space<vmem>>, vector<16x16xf32>
    %c0_1 = arith.constant 0 : index
    %c0_2 = arith.constant 0 : index
    %1 = vector.load %arg0[%c0_1, %c0_2] : memref<16x8xf32, #tpu.memory_space<vmem>>, vector<16x8xf32>
    %2 = arith.truncf %1 : vector<16x8xf32> to vector<16x8xbf16>
    %c0_3 = arith.constant 0 : index
    %c0_4 = arith.constant 0 : index
    %3 = vector.load %arg3[%c0_3, %c0_4] : memref<8x16xbf16, #tpu.memory_space<vmem>>, vector<8x16xbf16>
    %cst = arith.constant dense<0.000000e+00> : vector<16x16xf32>
    %4 = tpu.matmul %2, %3, %cst {dimension_numbers = #tpu.dot_dimension_numbers<[1], [0], [0], [1], [0, 0, 1, 1], [], []>} : vector<16x8xbf16>, vector<8x16xbf16>, vector<16x16xf32> -> vector<16x16xf32>
    %5 = arith.truncf %4 : vector<16x16xf32> to vector<16x16xbf16>
    %c0_5 = arith.constant 0 : index
    %c0_6 = arith.constant 0 : index
    %6 = vector.load %arg4[%c0_5, %c0_6] : memref<16x4xbf16, #tpu.memory_space<vmem>>, vector<16x4xbf16>
    %cst_7 = arith.constant dense<0.000000e+00> : vector<16x4xf32>
    %7 = tpu.matmul %5, %6, %cst_7 {dimension_numbers = #tpu.dot_dimension_numbers<[1], [0], [0], [1], [0, 0, 1, 1], [], []>} : vector<16x16xbf16>, vector<16x4xbf16>, vector<16x4xf32> -> vector<16x4xf32>
    %8 = vector.extract_strided_slice %7 {offsets = [0, 2], sizes = [16, 2], strides = [1, 1]} : vector<16x4xf32> to vector<16x2xf32>
    %9 = tpu.transpose %8, [1, 0] : vector<16x2xf32> -> vector<2x16xf32>
    %cst_8 = arith.constant 1.000000e+00 : bf16
    %10 = vector.broadcast %cst_8 : bf16 to vector<16x1xbf16>
    %c0_9 = arith.constant 0 : index
    %c0_10 = arith.constant 0 : index
    %11 = memref.load %arg5[%c0_9, %c0_10] : memref<4x2xf32, #tpu.memory_space<smem>>
    %c0_11 = arith.constant 0 : index
    %c0_12 = arith.constant 0 : index
    %c0_13 = arith.constant 0 : index
    %12 = vector.load %arg1[%c0_11, %c0_12, %c0_13] : memref<4x16x16xbf16, #tpu.memory_space<vmem>>, vector<1x16x16xbf16>
    %13 = vector.shape_cast %12 : vector<1x16x16xbf16> to vector<16x16xbf16>
    %14 = arith.extf %13 : vector<16x16xbf16> to vector<16x16xf32>
    %15 = vector.broadcast %11 : f32 to vector<16x16xf32>
    %16 = arith.mulf %15, %14 : vector<16x16xf32>
    %17 = arith.addf %0, %16 : vector<16x16xf32>
    %c1 = arith.constant 1 : index
    %c0_14 = arith.constant 0 : index
    %18 = memref.load %arg5[%c1, %c0_14] : memref<4x2xf32, #tpu.memory_space<smem>>
    %c1_15 = arith.constant 1 : index
    %c0_16 = arith.constant 0 : index
    %c0_17 = arith.constant 0 : index
    %19 = vector.load %arg1[%c1_15, %c0_16, %c0_17] : memref<4x16x16xbf16, #tpu.memory_space<vmem>>, vector<1x16x16xbf16>
    %20 = vector.shape_cast %19 : vector<1x16x16xbf16> to vector<16x16xbf16>
    %21 = arith.extf %20 : vector<16x16xbf16> to vector<16x16xf32>
    %22 = vector.broadcast %18 : f32 to vector<16x16xf32>
    %23 = arith.mulf %22, %21 : vector<16x16xf32>
    %24 = arith.addf %17, %23 : vector<16x16xf32>
    %c2 = arith.constant 2 : index
    %c0_18 = arith.constant 0 : index
    %25 = memref.load %arg5[%c2, %c0_18] : memref<4x2xf32, #tpu.memory_space<smem>>
    %c2_19 = arith.constant 2 : index
    %c0_20 = arith.constant 0 : index
    %c0_21 = arith.constant 0 : index
    %26 = vector.load %arg1[%c2_19, %c0_20, %c0_21] : memref<4x16x16xbf16, #tpu.memory_space<vmem>>, vector<1x16x16xbf16>
    %27 = vector.shape_cast %26 : vector<1x16x16xbf16> to vector<16x16xbf16>
    %28 = arith.extf %27 : vector<16x16xbf16> to vector<16x16xf32>
    %29 = vector.broadcast %25 : f32 to vector<16x16xf32>
    %30 = arith.mulf %29, %28 : vector<16x16xf32>
    %31 = arith.addf %24, %30 : vector<16x16xf32>
    %c3 = arith.constant 3 : index
    %c0_22 = arith.constant 0 : index
    %32 = memref.load %arg5[%c3, %c0_22] : memref<4x2xf32, #tpu.memory_space<smem>>
    %c3_23 = arith.constant 3 : index
    %c0_24 = arith.constant 0 : index
    %c0_25 = arith.constant 0 : index
    %33 = vector.load %arg1[%c3_23, %c0_24, %c0_25] : memref<4x16x16xbf16, #tpu.memory_space<vmem>>, vector<1x16x16xbf16>
    %34 = vector.shape_cast %33 : vector<1x16x16xbf16> to vector<16x16xbf16>
    %35 = arith.extf %34 : vector<16x16xbf16> to vector<16x16xf32>
    %36 = vector.broadcast %32 : f32 to vector<16x16xf32>
    %37 = arith.mulf %36, %35 : vector<16x16xf32>
    %38 = arith.addf %31, %37 : vector<16x16xf32>
    %39 = vector.extract_strided_slice %7 {offsets = [0, 0], sizes = [16, 1], strides = [1, 1]} : vector<16x4xf32> to vector<16x1xf32>
    %40 = vector.extract_strided_slice %9 {offsets = [0, 0], sizes = [1, 16], strides = [1, 1]} : vector<2x16xf32> to vector<1x16xf32>
    %41 = vector.broadcast %39 : vector<16x1xf32> to vector<16x16xf32>
    %42 = vector.broadcast %40 : vector<1x16xf32> to vector<16x16xf32>
    %43 = arith.addf %41, %42 : vector<16x16xf32>
    %44 = arith.addf %43, %38 : vector<16x16xf32>
    %cst_26 = arith.constant 0.000000e+00 : f32
    %45 = vector.broadcast %cst_26 : f32 to vector<16x16xf32>
    %46 = arith.cmpf oge, %44, %45 : vector<16x16xf32>
    %cst_27 = arith.constant 2.000000e-01 : f32
    %47 = vector.broadcast %cst_27 : f32 to vector<16x16xf32>
    %48 = arith.mulf %47, %44 : vector<16x16xf32>
    %49 = arith.select %46, %44, %48 : vector<16x16xi1>, vector<16x16xf32>
    %cst_28 = arith.constant dense<0xFF800000> : vector<16xf32>
    %50 = vector.multi_reduction <maximumf>, %49, %cst_28 [1] : vector<16x16xf32> to vector<16xf32>
    %51 = vector.shape_cast %50 : vector<16xf32> to vector<16x1xf32>
    %52 = vector.broadcast %51 : vector<16x1xf32> to vector<16x16xf32>
    %53 = arith.subf %49, %52 : vector<16x16xf32>
    %54 = math.exp %53 : vector<16x16xf32>
    %55 = vector.extract_strided_slice %4 {offsets = [0, 0], sizes = [16, 8], strides = [1, 1]} : vector<16x16xf32> to vector<16x8xf32>
    %56 = arith.truncf %55 : vector<16x8xf32> to vector<16x8xbf16>
    %57 = tpu.concatenate %56, %10 in 1 : vector<16x8xbf16>, vector<16x1xbf16> -> vector<16x9xbf16>
    %58 = arith.truncf %54 : vector<16x16xf32> to vector<16x16xbf16>
    %cst_29 = arith.constant dense<0.000000e+00> : vector<16x9xf32>
    %59 = tpu.matmul %58, %57, %cst_29 {dimension_numbers = #tpu.dot_dimension_numbers<[1], [0], [0], [1], [0, 0, 1, 1], [], []>} : vector<16x16xbf16>, vector<16x9xbf16>, vector<16x9xf32> -> vector<16x9xf32>
    %60 = vector.extract_strided_slice %59 {offsets = [0, 8], sizes = [16, 1], strides = [1, 1]} : vector<16x9xf32> to vector<16x1xf32>
    %61 = tpu.reciprocal %60 {approx = true} : vector<16x1xf32> -> vector<16x1xf32>
    %62 = vector.extract_strided_slice %59 {offsets = [0, 0], sizes = [16, 8], strides = [1, 1]} : vector<16x9xf32> to vector<16x8xf32>
    %63 = vector.broadcast %61 : vector<16x1xf32> to vector<16x8xf32>
    %64 = arith.mulf %62, %63 : vector<16x8xf32>
    %c0_30 = arith.constant 0 : index
    %c1_31 = arith.constant 1 : index
    %65 = memref.load %arg5[%c0_30, %c1_31] : memref<4x2xf32, #tpu.memory_space<smem>>
    %c0_32 = arith.constant 0 : index
    %c0_33 = arith.constant 0 : index
    %c0_34 = arith.constant 0 : index
    %66 = vector.load %arg1[%c0_32, %c0_33, %c0_34] : memref<4x16x16xbf16, #tpu.memory_space<vmem>>, vector<1x16x16xbf16>
    %67 = vector.shape_cast %66 : vector<1x16x16xbf16> to vector<16x16xbf16>
    %68 = arith.extf %67 : vector<16x16xbf16> to vector<16x16xf32>
    %69 = vector.broadcast %65 : f32 to vector<16x16xf32>
    %70 = arith.mulf %69, %68 : vector<16x16xf32>
    %71 = arith.addf %0, %70 : vector<16x16xf32>
    %c1_35 = arith.constant 1 : index
    %c1_36 = arith.constant 1 : index
    %72 = memref.load %arg5[%c1_35, %c1_36] : memref<4x2xf32, #tpu.memory_space<smem>>
    %c1_37 = arith.constant 1 : index
    %c0_38 = arith.constant 0 : index
    %c0_39 = arith.constant 0 : index
    %73 = vector.load %arg1[%c1_37, %c0_38, %c0_39] : memref<4x16x16xbf16, #tpu.memory_space<vmem>>, vector<1x16x16xbf16>
    %74 = vector.shape_cast %73 : vector<1x16x16xbf16> to vector<16x16xbf16>
    %75 = arith.extf %74 : vector<16x16xbf16> to vector<16x16xf32>
    %76 = vector.broadcast %72 : f32 to vector<16x16xf32>
    %77 = arith.mulf %76, %75 : vector<16x16xf32>
    %78 = arith.addf %71, %77 : vector<16x16xf32>
    %c2_40 = arith.constant 2 : index
    %c1_41 = arith.constant 1 : index
    %79 = memref.load %arg5[%c2_40, %c1_41] : memref<4x2xf32, #tpu.memory_space<smem>>
    %c2_42 = arith.constant 2 : index
    %c0_43 = arith.constant 0 : index
    %c0_44 = arith.constant 0 : index
    %80 = vector.load %arg1[%c2_42, %c0_43, %c0_44] : memref<4x16x16xbf16, #tpu.memory_space<vmem>>, vector<1x16x16xbf16>
    %81 = vector.shape_cast %80 : vector<1x16x16xbf16> to vector<16x16xbf16>
    %82 = arith.extf %81 : vector<16x16xbf16> to vector<16x16xf32>
    %83 = vector.broadcast %79 : f32 to vector<16x16xf32>
    %84 = arith.mulf %83, %82 : vector<16x16xf32>
    %85 = arith.addf %78, %84 : vector<16x16xf32>
    %c3_45 = arith.constant 3 : index
    %c1_46 = arith.constant 1 : index
    %86 = memref.load %arg5[%c3_45, %c1_46] : memref<4x2xf32, #tpu.memory_space<smem>>
    %c3_47 = arith.constant 3 : index
    %c0_48 = arith.constant 0 : index
    %c0_49 = arith.constant 0 : index
    %87 = vector.load %arg1[%c3_47, %c0_48, %c0_49] : memref<4x16x16xbf16, #tpu.memory_space<vmem>>, vector<1x16x16xbf16>
    %88 = vector.shape_cast %87 : vector<1x16x16xbf16> to vector<16x16xbf16>
    %89 = arith.extf %88 : vector<16x16xbf16> to vector<16x16xf32>
    %90 = vector.broadcast %86 : f32 to vector<16x16xf32>
    %91 = arith.mulf %90, %89 : vector<16x16xf32>
    %92 = arith.addf %85, %91 : vector<16x16xf32>
    %93 = vector.extract_strided_slice %7 {offsets = [0, 1], sizes = [16, 1], strides = [1, 1]} : vector<16x4xf32> to vector<16x1xf32>
    %94 = vector.extract_strided_slice %9 {offsets = [1, 0], sizes = [1, 16], strides = [1, 1]} : vector<2x16xf32> to vector<1x16xf32>
    %95 = vector.broadcast %93 : vector<16x1xf32> to vector<16x16xf32>
    %96 = vector.broadcast %94 : vector<1x16xf32> to vector<16x16xf32>
    %97 = arith.addf %95, %96 : vector<16x16xf32>
    %98 = arith.addf %97, %92 : vector<16x16xf32>
    %cst_50 = arith.constant 0.000000e+00 : f32
    %99 = vector.broadcast %cst_50 : f32 to vector<16x16xf32>
    %100 = arith.cmpf oge, %98, %99 : vector<16x16xf32>
    %cst_51 = arith.constant 2.000000e-01 : f32
    %101 = vector.broadcast %cst_51 : f32 to vector<16x16xf32>
    %102 = arith.mulf %101, %98 : vector<16x16xf32>
    %103 = arith.select %100, %98, %102 : vector<16x16xi1>, vector<16x16xf32>
    %cst_52 = arith.constant dense<0xFF800000> : vector<16xf32>
    %104 = vector.multi_reduction <maximumf>, %103, %cst_52 [1] : vector<16x16xf32> to vector<16xf32>
    %105 = vector.shape_cast %104 : vector<16xf32> to vector<16x1xf32>
    %106 = vector.broadcast %105 : vector<16x1xf32> to vector<16x16xf32>
    %107 = arith.subf %103, %106 : vector<16x16xf32>
    %108 = math.exp %107 : vector<16x16xf32>
    %109 = vector.extract_strided_slice %4 {offsets = [0, 8], sizes = [16, 8], strides = [1, 1]} : vector<16x16xf32> to vector<16x8xf32>
    %110 = arith.truncf %109 : vector<16x8xf32> to vector<16x8xbf16>
    %111 = tpu.concatenate %110, %10 in 1 : vector<16x8xbf16>, vector<16x1xbf16> -> vector<16x9xbf16>
    %112 = arith.truncf %108 : vector<16x16xf32> to vector<16x16xbf16>
    %cst_53 = arith.constant dense<0.000000e+00> : vector<16x9xf32>
    %113 = tpu.matmul %112, %111, %cst_53 {dimension_numbers = #tpu.dot_dimension_numbers<[1], [0], [0], [1], [0, 0, 1, 1], [], []>} : vector<16x16xbf16>, vector<16x9xbf16>, vector<16x9xf32> -> vector<16x9xf32>
    %114 = vector.extract_strided_slice %113 {offsets = [0, 8], sizes = [16, 1], strides = [1, 1]} : vector<16x9xf32> to vector<16x1xf32>
    %115 = tpu.reciprocal %114 {approx = true} : vector<16x1xf32> -> vector<16x1xf32>
    %116 = vector.extract_strided_slice %113 {offsets = [0, 0], sizes = [16, 8], strides = [1, 1]} : vector<16x9xf32> to vector<16x8xf32>
    %117 = vector.broadcast %115 : vector<16x1xf32> to vector<16x8xf32>
    %118 = arith.mulf %116, %117 : vector<16x8xf32>
    %119 = tpu.concatenate %64, %118 in 1 : vector<16x8xf32>, vector<16x8xf32> -> vector<16x16xf32>
    %c0_54 = arith.constant 0 : index
    %c0_55 = arith.constant 0 : index
    %120 = vector.load %arg6[%c0_54, %c0_55] : memref<1x16xf32, #tpu.memory_space<vmem>>, vector<1x16xf32>
    %121 = vector.broadcast %120 : vector<1x16xf32> to vector<16x16xf32>
    %122 = arith.addf %119, %121 : vector<16x16xf32>
    %cst_56 = arith.constant dense<0.000000e+00> : vector<16xf32>
    %123 = vector.multi_reduction <add>, %122, %cst_56 [0] : vector<16x16xf32> to vector<16xf32>
    %124 = vector.shape_cast %123 : vector<16xf32> to vector<1x16xf32>
    %cst_57 = arith.constant 1.600000e+01 : f32
    %125 = vector.broadcast %cst_57 : f32 to vector<1x16xf32>
    %126 = arith.divf %124, %125 : vector<1x16xf32>
    %127 = vector.broadcast %126 : vector<1x16xf32> to vector<16x16xf32>
    %128 = arith.subf %122, %127 : vector<16x16xf32>
    %129 = arith.mulf %128, %128 : vector<16x16xf32>
    %cst_58 = arith.constant dense<0.000000e+00> : vector<16xf32>
    %130 = vector.multi_reduction <add>, %129, %cst_58 [0] : vector<16x16xf32> to vector<16xf32>
    %131 = vector.shape_cast %130 : vector<16xf32> to vector<1x16xf32>
    %cst_59 = arith.constant 1.600000e+01 : f32
    %132 = vector.broadcast %cst_59 : f32 to vector<1x16xf32>
    %133 = arith.divf %131, %132 : vector<1x16xf32>
    %134 = vector.broadcast %126 : vector<1x16xf32> to vector<16x16xf32>
    %135 = arith.subf %122, %134 : vector<16x16xf32>
    %cst_60 = arith.constant 9.99999974E-6 : f32
    %136 = vector.broadcast %cst_60 : f32 to vector<1x16xf32>
    %137 = arith.addf %133, %136 : vector<1x16xf32>
    %138 = math.rsqrt %137 : vector<1x16xf32>
    %139 = vector.broadcast %138 : vector<1x16xf32> to vector<16x16xf32>
    %140 = arith.mulf %135, %139 : vector<16x16xf32>
    %c0_61 = arith.constant 0 : index
    %c0_62 = arith.constant 0 : index
    %141 = vector.load %arg7[%c0_61, %c0_62] : memref<1x16xf32, #tpu.memory_space<vmem>>, vector<1x16xf32>
    %142 = vector.broadcast %141 : vector<1x16xf32> to vector<16x16xf32>
    %143 = arith.mulf %140, %142 : vector<16x16xf32>
    %c0_63 = arith.constant 0 : index
    %c0_64 = arith.constant 0 : index
    %144 = vector.load %arg8[%c0_63, %c0_64] : memref<1x16xf32, #tpu.memory_space<vmem>>, vector<1x16xf32>
    %145 = vector.broadcast %144 : vector<1x16xf32> to vector<16x16xf32>
    %146 = arith.addf %143, %145 : vector<16x16xf32>
    %cst_65 = arith.constant 0.000000e+00 : f32
    %147 = vector.broadcast %cst_65 : f32 to vector<16x16xf32>
    %148 = arith.maximumf %146, %147 : vector<16x16xf32>
    %149 = arith.truncf %148 : vector<16x16xf32> to vector<16x16xbf16>
    %c0_66 = arith.constant 0 : index
    %c0_67 = arith.constant 0 : index
    %150 = vector.load %arg9[%c0_66, %c0_67] : memref<16x16xbf16, #tpu.memory_space<vmem>>, vector<16x16xbf16>
    %cst_68 = arith.constant dense<0.000000e+00> : vector<16x16xf32>
    %151 = tpu.matmul %149, %150, %cst_68 {dimension_numbers = #tpu.dot_dimension_numbers<[1], [0], [0], [1], [0, 0, 1, 1], [], []>} : vector<16x16xbf16>, vector<16x16xbf16>, vector<16x16xf32> -> vector<16x16xf32>
    %152 = arith.truncf %151 : vector<16x16xf32> to vector<16x16xbf16>
    %c0_69 = arith.constant 0 : index
    %c0_70 = arith.constant 0 : index
    %153 = vector.load %arg10[%c0_69, %c0_70] : memref<16x4xbf16, #tpu.memory_space<vmem>>, vector<16x4xbf16>
    %cst_71 = arith.constant dense<0.000000e+00> : vector<16x4xf32>
    %154 = tpu.matmul %152, %153, %cst_71 {dimension_numbers = #tpu.dot_dimension_numbers<[1], [0], [0], [1], [0, 0, 1, 1], [], []>} : vector<16x16xbf16>, vector<16x4xbf16>, vector<16x4xf32> -> vector<16x4xf32>
    %155 = vector.extract_strided_slice %154 {offsets = [0, 2], sizes = [16, 2], strides = [1, 1]} : vector<16x4xf32> to vector<16x2xf32>
    %156 = tpu.transpose %155, [1, 0] : vector<16x2xf32> -> vector<2x16xf32>
    %cst_72 = arith.constant 1.000000e+00 : bf16
    %157 = vector.broadcast %cst_72 : bf16 to vector<16x1xbf16>
    %c0_73 = arith.constant 0 : index
    %c0_74 = arith.constant 0 : index
    %158 = memref.load %arg11[%c0_73, %c0_74] : memref<4x2xf32, #tpu.memory_space<smem>>
    %c0_75 = arith.constant 0 : index
    %c0_76 = arith.constant 0 : index
    %c0_77 = arith.constant 0 : index
    %159 = vector.load %arg1[%c0_75, %c0_76, %c0_77] : memref<4x16x16xbf16, #tpu.memory_space<vmem>>, vector<1x16x16xbf16>
    %160 = vector.shape_cast %159 : vector<1x16x16xbf16> to vector<16x16xbf16>
    %161 = arith.extf %160 : vector<16x16xbf16> to vector<16x16xf32>
    %162 = vector.broadcast %158 : f32 to vector<16x16xf32>
    %163 = arith.mulf %162, %161 : vector<16x16xf32>
    %164 = arith.addf %0, %163 : vector<16x16xf32>
    %c1_78 = arith.constant 1 : index
    %c0_79 = arith.constant 0 : index
    %165 = memref.load %arg11[%c1_78, %c0_79] : memref<4x2xf32, #tpu.memory_space<smem>>
    %c1_80 = arith.constant 1 : index
    %c0_81 = arith.constant 0 : index
    %c0_82 = arith.constant 0 : index
    %166 = vector.load %arg1[%c1_80, %c0_81, %c0_82] : memref<4x16x16xbf16, #tpu.memory_space<vmem>>, vector<1x16x16xbf16>
    %167 = vector.shape_cast %166 : vector<1x16x16xbf16> to vector<16x16xbf16>
    %168 = arith.extf %167 : vector<16x16xbf16> to vector<16x16xf32>
    %169 = vector.broadcast %165 : f32 to vector<16x16xf32>
    %170 = arith.mulf %169, %168 : vector<16x16xf32>
    %171 = arith.addf %164, %170 : vector<16x16xf32>
    %c2_83 = arith.constant 2 : index
    %c0_84 = arith.constant 0 : index
    %172 = memref.load %arg11[%c2_83, %c0_84] : memref<4x2xf32, #tpu.memory_space<smem>>
    %c2_85 = arith.constant 2 : index
    %c0_86 = arith.constant 0 : index
    %c0_87 = arith.constant 0 : index
    %173 = vector.load %arg1[%c2_85, %c0_86, %c0_87] : memref<4x16x16xbf16, #tpu.memory_space<vmem>>, vector<1x16x16xbf16>
    %174 = vector.shape_cast %173 : vector<1x16x16xbf16> to vector<16x16xbf16>
    %175 = arith.extf %174 : vector<16x16xbf16> to vector<16x16xf32>
    %176 = vector.broadcast %172 : f32 to vector<16x16xf32>
    %177 = arith.mulf %176, %175 : vector<16x16xf32>
    %178 = arith.addf %171, %177 : vector<16x16xf32>
    %c3_88 = arith.constant 3 : index
    %c0_89 = arith.constant 0 : index
    %179 = memref.load %arg11[%c3_88, %c0_89] : memref<4x2xf32, #tpu.memory_space<smem>>
    %c3_90 = arith.constant 3 : index
    %c0_91 = arith.constant 0 : index
    %c0_92 = arith.constant 0 : index
    %180 = vector.load %arg1[%c3_90, %c0_91, %c0_92] : memref<4x16x16xbf16, #tpu.memory_space<vmem>>, vector<1x16x16xbf16>
    %181 = vector.shape_cast %180 : vector<1x16x16xbf16> to vector<16x16xbf16>
    %182 = arith.extf %181 : vector<16x16xbf16> to vector<16x16xf32>
    %183 = vector.broadcast %179 : f32 to vector<16x16xf32>
    %184 = arith.mulf %183, %182 : vector<16x16xf32>
    %185 = arith.addf %178, %184 : vector<16x16xf32>
    %186 = vector.extract_strided_slice %154 {offsets = [0, 0], sizes = [16, 1], strides = [1, 1]} : vector<16x4xf32> to vector<16x1xf32>
    %187 = vector.extract_strided_slice %156 {offsets = [0, 0], sizes = [1, 16], strides = [1, 1]} : vector<2x16xf32> to vector<1x16xf32>
    %188 = vector.broadcast %186 : vector<16x1xf32> to vector<16x16xf32>
    %189 = vector.broadcast %187 : vector<1x16xf32> to vector<16x16xf32>
    %190 = arith.addf %188, %189 : vector<16x16xf32>
    %191 = arith.addf %190, %185 : vector<16x16xf32>
    %cst_93 = arith.constant 0.000000e+00 : f32
    %192 = vector.broadcast %cst_93 : f32 to vector<16x16xf32>
    %193 = arith.cmpf oge, %191, %192 : vector<16x16xf32>
    %cst_94 = arith.constant 2.000000e-01 : f32
    %194 = vector.broadcast %cst_94 : f32 to vector<16x16xf32>
    %195 = arith.mulf %194, %191 : vector<16x16xf32>
    %196 = arith.select %193, %191, %195 : vector<16x16xi1>, vector<16x16xf32>
    %cst_95 = arith.constant dense<0xFF800000> : vector<16xf32>
    %197 = vector.multi_reduction <maximumf>, %196, %cst_95 [1] : vector<16x16xf32> to vector<16xf32>
    %198 = vector.shape_cast %197 : vector<16xf32> to vector<16x1xf32>
    %199 = vector.broadcast %198 : vector<16x1xf32> to vector<16x16xf32>
    %200 = arith.subf %196, %199 : vector<16x16xf32>
    %201 = math.exp %200 : vector<16x16xf32>
    %202 = vector.extract_strided_slice %151 {offsets = [0, 0], sizes = [16, 8], strides = [1, 1]} : vector<16x16xf32> to vector<16x8xf32>
    %203 = arith.truncf %202 : vector<16x8xf32> to vector<16x8xbf16>
    %204 = tpu.concatenate %203, %157 in 1 : vector<16x8xbf16>, vector<16x1xbf16> -> vector<16x9xbf16>
    %205 = arith.truncf %201 : vector<16x16xf32> to vector<16x16xbf16>
    %cst_96 = arith.constant dense<0.000000e+00> : vector<16x9xf32>
    %206 = tpu.matmul %205, %204, %cst_96 {dimension_numbers = #tpu.dot_dimension_numbers<[1], [0], [0], [1], [0, 0, 1, 1], [], []>} : vector<16x16xbf16>, vector<16x9xbf16>, vector<16x9xf32> -> vector<16x9xf32>
    %207 = vector.extract_strided_slice %206 {offsets = [0, 8], sizes = [16, 1], strides = [1, 1]} : vector<16x9xf32> to vector<16x1xf32>
    %208 = tpu.reciprocal %207 {approx = true} : vector<16x1xf32> -> vector<16x1xf32>
    %209 = vector.extract_strided_slice %206 {offsets = [0, 0], sizes = [16, 8], strides = [1, 1]} : vector<16x9xf32> to vector<16x8xf32>
    %210 = vector.broadcast %208 : vector<16x1xf32> to vector<16x8xf32>
    %211 = arith.mulf %209, %210 : vector<16x8xf32>
    %c0_97 = arith.constant 0 : index
    %c1_98 = arith.constant 1 : index
    %212 = memref.load %arg11[%c0_97, %c1_98] : memref<4x2xf32, #tpu.memory_space<smem>>
    %c0_99 = arith.constant 0 : index
    %c0_100 = arith.constant 0 : index
    %c0_101 = arith.constant 0 : index
    %213 = vector.load %arg1[%c0_99, %c0_100, %c0_101] : memref<4x16x16xbf16, #tpu.memory_space<vmem>>, vector<1x16x16xbf16>
    %214 = vector.shape_cast %213 : vector<1x16x16xbf16> to vector<16x16xbf16>
    %215 = arith.extf %214 : vector<16x16xbf16> to vector<16x16xf32>
    %216 = vector.broadcast %212 : f32 to vector<16x16xf32>
    %217 = arith.mulf %216, %215 : vector<16x16xf32>
    %218 = arith.addf %0, %217 : vector<16x16xf32>
    %c1_102 = arith.constant 1 : index
    %c1_103 = arith.constant 1 : index
    %219 = memref.load %arg11[%c1_102, %c1_103] : memref<4x2xf32, #tpu.memory_space<smem>>
    %c1_104 = arith.constant 1 : index
    %c0_105 = arith.constant 0 : index
    %c0_106 = arith.constant 0 : index
    %220 = vector.load %arg1[%c1_104, %c0_105, %c0_106] : memref<4x16x16xbf16, #tpu.memory_space<vmem>>, vector<1x16x16xbf16>
    %221 = vector.shape_cast %220 : vector<1x16x16xbf16> to vector<16x16xbf16>
    %222 = arith.extf %221 : vector<16x16xbf16> to vector<16x16xf32>
    %223 = vector.broadcast %219 : f32 to vector<16x16xf32>
    %224 = arith.mulf %223, %222 : vector<16x16xf32>
    %225 = arith.addf %218, %224 : vector<16x16xf32>
    %c2_107 = arith.constant 2 : index
    %c1_108 = arith.constant 1 : index
    %226 = memref.load %arg11[%c2_107, %c1_108] : memref<4x2xf32, #tpu.memory_space<smem>>
    %c2_109 = arith.constant 2 : index
    %c0_110 = arith.constant 0 : index
    %c0_111 = arith.constant 0 : index
    %227 = vector.load %arg1[%c2_109, %c0_110, %c0_111] : memref<4x16x16xbf16, #tpu.memory_space<vmem>>, vector<1x16x16xbf16>
    %228 = vector.shape_cast %227 : vector<1x16x16xbf16> to vector<16x16xbf16>
    %229 = arith.extf %228 : vector<16x16xbf16> to vector<16x16xf32>
    %230 = vector.broadcast %226 : f32 to vector<16x16xf32>
    %231 = arith.mulf %230, %229 : vector<16x16xf32>
    %232 = arith.addf %225, %231 : vector<16x16xf32>
    %c3_112 = arith.constant 3 : index
    %c1_113 = arith.constant 1 : index
    %233 = memref.load %arg11[%c3_112, %c1_113] : memref<4x2xf32, #tpu.memory_space<smem>>
    %c3_114 = arith.constant 3 : index
    %c0_115 = arith.constant 0 : index
    %c0_116 = arith.constant 0 : index
    %234 = vector.load %arg1[%c3_114, %c0_115, %c0_116] : memref<4x16x16xbf16, #tpu.memory_space<vmem>>, vector<1x16x16xbf16>
    %235 = vector.shape_cast %234 : vector<1x16x16xbf16> to vector<16x16xbf16>
    %236 = arith.extf %235 : vector<16x16xbf16> to vector<16x16xf32>
    %237 = vector.broadcast %233 : f32 to vector<16x16xf32>
    %238 = arith.mulf %237, %236 : vector<16x16xf32>
    %239 = arith.addf %232, %238 : vector<16x16xf32>
    %240 = vector.extract_strided_slice %154 {offsets = [0, 1], sizes = [16, 1], strides = [1, 1]} : vector<16x4xf32> to vector<16x1xf32>
    %241 = vector.extract_strided_slice %156 {offsets = [1, 0], sizes = [1, 16], strides = [1, 1]} : vector<2x16xf32> to vector<1x16xf32>
    %242 = vector.broadcast %240 : vector<16x1xf32> to vector<16x16xf32>
    %243 = vector.broadcast %241 : vector<1x16xf32> to vector<16x16xf32>
    %244 = arith.addf %242, %243 : vector<16x16xf32>
    %245 = arith.addf %244, %239 : vector<16x16xf32>
    %cst_117 = arith.constant 0.000000e+00 : f32
    %246 = vector.broadcast %cst_117 : f32 to vector<16x16xf32>
    %247 = arith.cmpf oge, %245, %246 : vector<16x16xf32>
    %cst_118 = arith.constant 2.000000e-01 : f32
    %248 = vector.broadcast %cst_118 : f32 to vector<16x16xf32>
    %249 = arith.mulf %248, %245 : vector<16x16xf32>
    %250 = arith.select %247, %245, %249 : vector<16x16xi1>, vector<16x16xf32>
    %cst_119 = arith.constant dense<0xFF800000> : vector<16xf32>
    %251 = vector.multi_reduction <maximumf>, %250, %cst_119 [1] : vector<16x16xf32> to vector<16xf32>
    %252 = vector.shape_cast %251 : vector<16xf32> to vector<16x1xf32>
    %253 = vector.broadcast %252 : vector<16x1xf32> to vector<16x16xf32>
    %254 = arith.subf %250, %253 : vector<16x16xf32>
    %255 = math.exp %254 : vector<16x16xf32>
    %256 = vector.extract_strided_slice %151 {offsets = [0, 8], sizes = [16, 8], strides = [1, 1]} : vector<16x16xf32> to vector<16x8xf32>
    %257 = arith.truncf %256 : vector<16x8xf32> to vector<16x8xbf16>
    %258 = tpu.concatenate %257, %157 in 1 : vector<16x8xbf16>, vector<16x1xbf16> -> vector<16x9xbf16>
    %259 = arith.truncf %255 : vector<16x16xf32> to vector<16x16xbf16>
    %cst_120 = arith.constant dense<0.000000e+00> : vector<16x9xf32>
    %260 = tpu.matmul %259, %258, %cst_120 {dimension_numbers = #tpu.dot_dimension_numbers<[1], [0], [0], [1], [0, 0, 1, 1], [], []>} : vector<16x16xbf16>, vector<16x9xbf16>, vector<16x9xf32> -> vector<16x9xf32>
    %261 = vector.extract_strided_slice %260 {offsets = [0, 8], sizes = [16, 1], strides = [1, 1]} : vector<16x9xf32> to vector<16x1xf32>
    %262 = tpu.reciprocal %261 {approx = true} : vector<16x1xf32> -> vector<16x1xf32>
    %263 = vector.extract_strided_slice %260 {offsets = [0, 0], sizes = [16, 8], strides = [1, 1]} : vector<16x9xf32> to vector<16x8xf32>
    %264 = vector.broadcast %262 : vector<16x1xf32> to vector<16x8xf32>
    %265 = arith.mulf %263, %264 : vector<16x8xf32>
    %266 = tpu.concatenate %211, %265 in 1 : vector<16x8xf32>, vector<16x8xf32> -> vector<16x16xf32>
    %c0_121 = arith.constant 0 : index
    %c0_122 = arith.constant 0 : index
    %267 = vector.load %arg12[%c0_121, %c0_122] : memref<1x16xf32, #tpu.memory_space<vmem>>, vector<1x16xf32>
    %268 = vector.broadcast %267 : vector<1x16xf32> to vector<16x16xf32>
    %269 = arith.addf %266, %268 : vector<16x16xf32>
    %cst_123 = arith.constant dense<0.000000e+00> : vector<16xf32>
    %270 = vector.multi_reduction <add>, %269, %cst_123 [0] : vector<16x16xf32> to vector<16xf32>
    %271 = vector.shape_cast %270 : vector<16xf32> to vector<1x16xf32>
    %cst_124 = arith.constant 1.600000e+01 : f32
    %272 = vector.broadcast %cst_124 : f32 to vector<1x16xf32>
    %273 = arith.divf %271, %272 : vector<1x16xf32>
    %274 = vector.broadcast %273 : vector<1x16xf32> to vector<16x16xf32>
    %275 = arith.subf %269, %274 : vector<16x16xf32>
    %276 = arith.mulf %275, %275 : vector<16x16xf32>
    %cst_125 = arith.constant dense<0.000000e+00> : vector<16xf32>
    %277 = vector.multi_reduction <add>, %276, %cst_125 [0] : vector<16x16xf32> to vector<16xf32>
    %278 = vector.shape_cast %277 : vector<16xf32> to vector<1x16xf32>
    %cst_126 = arith.constant 1.600000e+01 : f32
    %279 = vector.broadcast %cst_126 : f32 to vector<1x16xf32>
    %280 = arith.divf %278, %279 : vector<1x16xf32>
    %281 = vector.broadcast %273 : vector<1x16xf32> to vector<16x16xf32>
    %282 = arith.subf %269, %281 : vector<16x16xf32>
    %cst_127 = arith.constant 9.99999974E-6 : f32
    %283 = vector.broadcast %cst_127 : f32 to vector<1x16xf32>
    %284 = arith.addf %280, %283 : vector<1x16xf32>
    %285 = math.rsqrt %284 : vector<1x16xf32>
    %286 = vector.broadcast %285 : vector<1x16xf32> to vector<16x16xf32>
    %287 = arith.mulf %282, %286 : vector<16x16xf32>
    %c0_128 = arith.constant 0 : index
    %c0_129 = arith.constant 0 : index
    %288 = vector.load %arg13[%c0_128, %c0_129] : memref<1x16xf32, #tpu.memory_space<vmem>>, vector<1x16xf32>
    %289 = vector.broadcast %288 : vector<1x16xf32> to vector<16x16xf32>
    %290 = arith.mulf %287, %289 : vector<16x16xf32>
    %c0_130 = arith.constant 0 : index
    %c0_131 = arith.constant 0 : index
    %291 = vector.load %arg14[%c0_130, %c0_131] : memref<1x16xf32, #tpu.memory_space<vmem>>, vector<1x16xf32>
    %292 = vector.broadcast %291 : vector<1x16xf32> to vector<16x16xf32>
    %293 = arith.addf %290, %292 : vector<16x16xf32>
    %cst_132 = arith.constant 0.000000e+00 : f32
    %294 = vector.broadcast %cst_132 : f32 to vector<16x16xf32>
    %295 = arith.maximumf %293, %294 : vector<16x16xf32>
    %296 = arith.truncf %295 : vector<16x16xf32> to vector<16x16xbf16>
    %c0_133 = arith.constant 0 : index
    %c0_134 = arith.constant 0 : index
    %297 = vector.load %arg15[%c0_133, %c0_134] : memref<16x8xbf16, #tpu.memory_space<vmem>>, vector<16x8xbf16>
    %cst_135 = arith.constant dense<0.000000e+00> : vector<16x8xf32>
    %298 = tpu.matmul %296, %297, %cst_135 {dimension_numbers = #tpu.dot_dimension_numbers<[1], [0], [0], [1], [0, 0, 1, 1], [], []>} : vector<16x16xbf16>, vector<16x8xbf16>, vector<16x8xf32> -> vector<16x8xf32>
    %299 = arith.truncf %298 : vector<16x8xf32> to vector<16x8xbf16>
    %c0_136 = arith.constant 0 : index
    %c0_137 = arith.constant 0 : index
    %300 = vector.load %arg16[%c0_136, %c0_137] : memref<8x2xbf16, #tpu.memory_space<vmem>>, vector<8x2xbf16>
    %cst_138 = arith.constant dense<0.000000e+00> : vector<16x2xf32>
    %301 = tpu.matmul %299, %300, %cst_138 {dimension_numbers = #tpu.dot_dimension_numbers<[1], [0], [0], [1], [0, 0, 1, 1], [], []>} : vector<16x8xbf16>, vector<8x2xbf16>, vector<16x2xf32> -> vector<16x2xf32>
    %302 = vector.extract_strided_slice %301 {offsets = [0, 1], sizes = [16, 1], strides = [1, 1]} : vector<16x2xf32> to vector<16x1xf32>
    %303 = tpu.transpose %302, [1, 0] : vector<16x1xf32> -> vector<1x16xf32>
    %cst_139 = arith.constant 1.000000e+00 : bf16
    %304 = vector.broadcast %cst_139 : bf16 to vector<16x1xbf16>
    %c0_140 = arith.constant 0 : index
    %c0_141 = arith.constant 0 : index
    %305 = memref.load %arg17[%c0_140, %c0_141] : memref<4x1xf32, #tpu.memory_space<smem>>
    %c0_142 = arith.constant 0 : index
    %c0_143 = arith.constant 0 : index
    %c0_144 = arith.constant 0 : index
    %306 = vector.load %arg1[%c0_142, %c0_143, %c0_144] : memref<4x16x16xbf16, #tpu.memory_space<vmem>>, vector<1x16x16xbf16>
    %307 = vector.shape_cast %306 : vector<1x16x16xbf16> to vector<16x16xbf16>
    %308 = arith.extf %307 : vector<16x16xbf16> to vector<16x16xf32>
    %309 = vector.broadcast %305 : f32 to vector<16x16xf32>
    %310 = arith.mulf %309, %308 : vector<16x16xf32>
    %311 = arith.addf %0, %310 : vector<16x16xf32>
    %c1_145 = arith.constant 1 : index
    %c0_146 = arith.constant 0 : index
    %312 = memref.load %arg17[%c1_145, %c0_146] : memref<4x1xf32, #tpu.memory_space<smem>>
    %c1_147 = arith.constant 1 : index
    %c0_148 = arith.constant 0 : index
    %c0_149 = arith.constant 0 : index
    %313 = vector.load %arg1[%c1_147, %c0_148, %c0_149] : memref<4x16x16xbf16, #tpu.memory_space<vmem>>, vector<1x16x16xbf16>
    %314 = vector.shape_cast %313 : vector<1x16x16xbf16> to vector<16x16xbf16>
    %315 = arith.extf %314 : vector<16x16xbf16> to vector<16x16xf32>
    %316 = vector.broadcast %312 : f32 to vector<16x16xf32>
    %317 = arith.mulf %316, %315 : vector<16x16xf32>
    %318 = arith.addf %311, %317 : vector<16x16xf32>
    %c2_150 = arith.constant 2 : index
    %c0_151 = arith.constant 0 : index
    %319 = memref.load %arg17[%c2_150, %c0_151] : memref<4x1xf32, #tpu.memory_space<smem>>
    %c2_152 = arith.constant 2 : index
    %c0_153 = arith.constant 0 : index
    %c0_154 = arith.constant 0 : index
    %320 = vector.load %arg1[%c2_152, %c0_153, %c0_154] : memref<4x16x16xbf16, #tpu.memory_space<vmem>>, vector<1x16x16xbf16>
    %321 = vector.shape_cast %320 : vector<1x16x16xbf16> to vector<16x16xbf16>
    %322 = arith.extf %321 : vector<16x16xbf16> to vector<16x16xf32>
    %323 = vector.broadcast %319 : f32 to vector<16x16xf32>
    %324 = arith.mulf %323, %322 : vector<16x16xf32>
    %325 = arith.addf %318, %324 : vector<16x16xf32>
    %c3_155 = arith.constant 3 : index
    %c0_156 = arith.constant 0 : index
    %326 = memref.load %arg17[%c3_155, %c0_156] : memref<4x1xf32, #tpu.memory_space<smem>>
    %c3_157 = arith.constant 3 : index
    %c0_158 = arith.constant 0 : index
    %c0_159 = arith.constant 0 : index
    %327 = vector.load %arg1[%c3_157, %c0_158, %c0_159] : memref<4x16x16xbf16, #tpu.memory_space<vmem>>, vector<1x16x16xbf16>
    %328 = vector.shape_cast %327 : vector<1x16x16xbf16> to vector<16x16xbf16>
    %329 = arith.extf %328 : vector<16x16xbf16> to vector<16x16xf32>
    %330 = vector.broadcast %326 : f32 to vector<16x16xf32>
    %331 = arith.mulf %330, %329 : vector<16x16xf32>
    %332 = arith.addf %325, %331 : vector<16x16xf32>
    %333 = vector.extract_strided_slice %301 {offsets = [0, 0], sizes = [16, 1], strides = [1, 1]} : vector<16x2xf32> to vector<16x1xf32>
    %334 = vector.broadcast %333 : vector<16x1xf32> to vector<16x16xf32>
    %335 = vector.broadcast %303 : vector<1x16xf32> to vector<16x16xf32>
    %336 = arith.addf %334, %335 : vector<16x16xf32>
    %337 = arith.addf %336, %332 : vector<16x16xf32>
    %cst_160 = arith.constant 0.000000e+00 : f32
    %338 = vector.broadcast %cst_160 : f32 to vector<16x16xf32>
    %339 = arith.cmpf oge, %337, %338 : vector<16x16xf32>
    %cst_161 = arith.constant 2.000000e-01 : f32
    %340 = vector.broadcast %cst_161 : f32 to vector<16x16xf32>
    %341 = arith.mulf %340, %337 : vector<16x16xf32>
    %342 = arith.select %339, %337, %341 : vector<16x16xi1>, vector<16x16xf32>
    %cst_162 = arith.constant dense<0xFF800000> : vector<16xf32>
    %343 = vector.multi_reduction <maximumf>, %342, %cst_162 [1] : vector<16x16xf32> to vector<16xf32>
    %344 = vector.shape_cast %343 : vector<16xf32> to vector<16x1xf32>
    %345 = vector.broadcast %344 : vector<16x1xf32> to vector<16x16xf32>
    %346 = arith.subf %342, %345 : vector<16x16xf32>
    %347 = math.exp %346 : vector<16x16xf32>
    %348 = arith.truncf %298 : vector<16x8xf32> to vector<16x8xbf16>
    %349 = tpu.concatenate %348, %304 in 1 : vector<16x8xbf16>, vector<16x1xbf16> -> vector<16x9xbf16>
    %350 = arith.truncf %347 : vector<16x16xf32> to vector<16x16xbf16>
    %cst_163 = arith.constant dense<0.000000e+00> : vector<16x9xf32>
    %351 = tpu.matmul %350, %349, %cst_163 {dimension_numbers = #tpu.dot_dimension_numbers<[1], [0], [0], [1], [0, 0, 1, 1], [], []>} : vector<16x16xbf16>, vector<16x9xbf16>, vector<16x9xf32> -> vector<16x9xf32>
    %352 = vector.extract_strided_slice %351 {offsets = [0, 8], sizes = [16, 1], strides = [1, 1]} : vector<16x9xf32> to vector<16x1xf32>
    %353 = tpu.reciprocal %352 {approx = true} : vector<16x1xf32> -> vector<16x1xf32>
    %354 = vector.extract_strided_slice %351 {offsets = [0, 0], sizes = [16, 8], strides = [1, 1]} : vector<16x9xf32> to vector<16x8xf32>
    %355 = vector.broadcast %353 : vector<16x1xf32> to vector<16x8xf32>
    %356 = arith.mulf %354, %355 : vector<16x8xf32>
    %c0_164 = arith.constant 0 : index
    %c0_165 = arith.constant 0 : index
    %357 = vector.load %arg18[%c0_164, %c0_165] : memref<1x8xf32, #tpu.memory_space<vmem>>, vector<1x8xf32>
    %358 = vector.broadcast %357 : vector<1x8xf32> to vector<16x8xf32>
    %359 = arith.addf %356, %358 : vector<16x8xf32>
    %cst_166 = arith.constant dense<0.000000e+00> : vector<8xf32>
    %360 = vector.multi_reduction <add>, %359, %cst_166 [0] : vector<16x8xf32> to vector<8xf32>
    %361 = vector.shape_cast %360 : vector<8xf32> to vector<1x8xf32>
    %cst_167 = arith.constant 1.600000e+01 : f32
    %362 = vector.broadcast %cst_167 : f32 to vector<1x8xf32>
    %363 = arith.divf %361, %362 : vector<1x8xf32>
    %364 = vector.broadcast %363 : vector<1x8xf32> to vector<16x8xf32>
    %365 = arith.subf %359, %364 : vector<16x8xf32>
    %366 = arith.mulf %365, %365 : vector<16x8xf32>
    %cst_168 = arith.constant dense<0.000000e+00> : vector<8xf32>
    %367 = vector.multi_reduction <add>, %366, %cst_168 [0] : vector<16x8xf32> to vector<8xf32>
    %368 = vector.shape_cast %367 : vector<8xf32> to vector<1x8xf32>
    %cst_169 = arith.constant 1.600000e+01 : f32
    %369 = vector.broadcast %cst_169 : f32 to vector<1x8xf32>
    %370 = arith.divf %368, %369 : vector<1x8xf32>
    %371 = vector.broadcast %363 : vector<1x8xf32> to vector<16x8xf32>
    %372 = arith.subf %359, %371 : vector<16x8xf32>
    %cst_170 = arith.constant 9.99999974E-6 : f32
    %373 = vector.broadcast %cst_170 : f32 to vector<1x8xf32>
    %374 = arith.addf %370, %373 : vector<1x8xf32>
    %375 = math.rsqrt %374 : vector<1x8xf32>
    %376 = vector.broadcast %375 : vector<1x8xf32> to vector<16x8xf32>
    %377 = arith.mulf %372, %376 : vector<16x8xf32>
    %c0_171 = arith.constant 0 : index
    %c0_172 = arith.constant 0 : index
    %378 = vector.load %arg19[%c0_171, %c0_172] : memref<1x8xf32, #tpu.memory_space<vmem>>, vector<1x8xf32>
    %379 = vector.broadcast %378 : vector<1x8xf32> to vector<16x8xf32>
    %380 = arith.mulf %377, %379 : vector<16x8xf32>
    %c0_173 = arith.constant 0 : index
    %c0_174 = arith.constant 0 : index
    %381 = vector.load %arg20[%c0_173, %c0_174] : memref<1x8xf32, #tpu.memory_space<vmem>>, vector<1x8xf32>
    %382 = vector.broadcast %381 : vector<1x8xf32> to vector<16x8xf32>
    %383 = arith.addf %380, %382 : vector<16x8xf32>
    %cst_175 = arith.constant 0.000000e+00 : f32
    %384 = vector.broadcast %cst_175 : f32 to vector<16x8xf32>
    %385 = arith.maximumf %383, %384 : vector<16x8xf32>
    %c0_176 = arith.constant 0 : index
    %c0_177 = arith.constant 0 : index
    %386 = vector.load %arg21[%c0_176, %c0_177] : memref<16x8xf32, #tpu.memory_space<vmem>>, vector<16x8xf32>
    tpu.vector_store %arg21[%c0_176, %c0_177], %385 {strides = array<i32>} : memref<16x8xf32, #tpu.memory_space<vmem>>, vector<16x8xf32>,
    return
  }
}

</mosaic_0001>

<bundles_post_ra>
// kernel: tpu_custom_call.1
= control target key start
LH: loop header
LB: loop body
LE: loop exit
PB: predicated region body
PF: predicated region fallthrough
CT: control target
= control target key end

     0   :  { %s1683_s0 = inlined_call_operand.vmem [shape: f32[16,8], index: 0, kind: input, shape index: {}]   ;;  %s1684_s1 = inlined_call_operand.hbm [shape: bf16[4,16,16], index: 1, kind: input, shape index: {}]   ;;  %s1685_s2 = inlined_call_operand.vmem [shape: f32[16,16], index: 2, kind: input, shape index: {}]   ;;  %s1686_s3 = inlined_call_operand.vmem [shape: bf16[8,16], index: 3, kind: input, shape index: {}]   ;;  %s1687_s4 = inlined_call_operand.vmem [shape: bf16[16,4], index: 4, kind: input, shape index: {}]   ;;  %s1688_s5 = inlined_call_operand.vmem [shape: f32[4,2], index: 5, kind: input, shape index: {}]   ;;  %s1689_s6 = inlined_call_operand.vmem [shape: f32[1,16], index: 6, kind: input, shape index: {}]   ;;  %s1690_s7 = inlined_call_operand.vmem [shape: f32[1,16], index: 7, kind: input, shape index: {}]   ;;  %s1691_s8 = inlined_call_operand.vmem [shape: f32[1,16], index: 8, kind: input, shape index: {}]   ;;  %s1692_s9 = inlined_call_operand.vmem [shape: bf16[16,16], index: 9, kind: input, shape index: {}]   ;;  %s1693_s10 = inlined_call_operand.vmem [shape: bf16[16,4], index: 10, kind: input, shape index: {}]   ;;  %s1694_s11 = inlined_call_operand.vmem [shape: f32[4,2], index: 11, kind: input, shape index: {}]   ;;  %s1695_s12 = inlined_call_operand.vmem [shape: f32[1,16], index: 12, kind: input, shape index: {}]   ;;  %s1696_s13 = inlined_call_operand.vmem [shape: f32[1,16], index: 13, kind: input, shape index: {}]   ;;  %s1697_s14 = inlined_call_operand.vmem [shape: f32[1,16], index: 14, kind: input, shape index: {}]   ;;  %s1698_s15 = inlined_call_operand.vmem [shape: bf16[16,8], index: 15, kind: input, shape index: {}]   ;;  %s1699_s16 = inlined_call_operand.vmem [shape: bf16[8,2], index: 16, kind: input, shape index: {}]   ;;  %s1700_s17 = inlined_call_operand.vmem [shape: f32[4,1], index: 17, kind: input, shape index: {}]   ;;  %s1701_s18 = inlined_call_operand.vmem [shape: f32[1,8], index: 18, kind: input, shape index: {}]   ;;  %s1702_s19 = inlined_call_operand.vmem [shape: f32[1,8], index: 19, kind: input, shape index: {}]   ;;  %s1703_s20 = inlined_call_operand.vmem [shape: f32[1,8], index: 20, kind: input, shape index: {}]   ;;  %s1704_s21 = inlined_call_operand.vmem [shape: f32[16,8], index: 21, kind: output, shape index: {}]  }
   0x1   :  { %1708 = sst [smem:[#allocation12_spill]] %s1683_s0 }
   0x2   :  { %1709 = sst [smem:[#allocation13_spill]] %s1684_s1 }
   0x3   :  { %1710 = sst [smem:[#allocation14_spill]] %s1685_s2 }
   0x4   :  { %1711 = sst [smem:[#allocation15_spill]] %s1686_s3 }
   0x5   :  { %1712 = sst [smem:[#allocation16_spill]] %s1687_s4 }
   0x6   :  { %1713 = sst [smem:[#allocation17_spill]] %s1688_s5 }
   0x7   :  { %1714 = sst [smem:[#allocation18_spill]] %s1704_s21 }
   0x8   :  { %26 = vsyncpa [#allocation3], 0 }
   0x9   :  { %27 = vsyncpa [#allocation4], 0 }
   0xa   :  { %28 = vsyncpa [#allocation7], 0  ;;  %s74_s26 = sshll.u32 %s1694_s11, 4  ;;  %s1715_s28 = sld [smem:[#allocation13_spill]]  ;;  %s75_s26 = int_to_ptr.vmem [resolvable:$true] %s74_s26 }
   0xb   :  { %s1314_s0 = smov [#allocation6]   ;;  %s1315_s4 = smov [#allocation2]  }
   0xc   :  { %77 = dma.vmem_to_smem %s75_s26, 64, %s1314_s0, [#allocation7]  }
   0xd   :  { %s37_s30 = sshll.u32 %s1315_s4, 4  ;;  %s1316_s5 = smov 64   ;;  %s38_s30 = int_to_ptr.vmem [resolvable:$true] %s37_s30 }
   0xe   :  { %s1317_s22 = smov 4   ;;  %s1716_s24 = sld [smem:[#allocation17_spill]] }
   0xf   :  { %s93_s25 = sshll.u32 %s1700_s17, 4  ;;  %s1318_s27 = smov [#allocation5]   ;;  %s94_s25 = int_to_ptr.vmem [resolvable:$true] %s93_s25 }
  0x10   :  { %s35_s29 = sshll.u32 %s1715_s28, 4  ;;  %s1319_s26 = smov [#allocation8]   ;;  %s36_s29 = int_to_ptr.hbm [resolvable:$true] %s35_s29 }
  0x11   :  { %43 = dma.hbm_to_vmem [thread:$0]  %s36_s29, 512, %s38_s30, [#allocation3], %s1316_s5, %s1316_s5, %s1317_s22  }
  0x12   :  { %96 = dma.vmem_to_smem %s94_s25, 64, %s1319_s26, [#allocation7]  }
  0x14   :  { %s55_s21 = sshll.u32 %s1716_s24, 4  ;;  %s56_s21 = int_to_ptr.vmem [resolvable:$true] %s55_s21 }
  0x15   :  { %58 = dma.vmem_to_smem %s56_s21, 64, %s1318_s27, [#allocation4]  }
  0x16   :  { %1308 = dma.done.wait [#allocation3], 512  }
  0x17   :  { %1309 = vsyncadd [#allocation3], 4294966784 }
  0x18   :  { %1310 = dma.done.wait [#allocation4], 64  }
  0x19   :  { %1311 = vsyncadd [#allocation4], 4294967232 }
  0x1a   :  { %1312 = dma.done.wait [#allocation7], 128  }
  0x1b   :  { %1313 = vsyncadd [#allocation7], 4294967168 }
  0x1c   :  { %119 = sfence }
  0x1d   :  { %s1717_s29 = sld [smem:[#allocation15_spill]]  ;;  %vm132_vm0 = vcmask 1043456   ;;  %vm128_vm1 = vcmask 64512   ;;  %v1320_v6 = vmov 1   ;;  %vm159_vm2 = vcmask 130048   ;;  %s1322_s1 = smov 126  }
  0x1e   :  { %s1718_s17 = sld [smem:[#allocation12_spill]]  ;;  %1176 = vset.pattern.permute.xlu1 %v1320_v6  ;;  %v1321_v16 = vmov 0   ;;  %s1323_s24 = smov 120   ;;  %v1146_v24 = vld [vmem:[#allocation2] sm:$0xff]   ;;  %v1150_v28 = vld [vmem:[#allocation2 + $0x8] sm:$0xff]   ;;  %v1154_v35 = vld [vmem:[#allocation2 + $0x10] sm:$0xff]  }
  0x1f   :  { %s1719_s23 = sld [smem:[#allocation16_spill]]  ;;  %1177 = vset.pattern.permute.xlu0 %v1321_v16  ;;  %v1480_v25 = vunpack.c.l.bf16 %v1146_v24  ;;  %v1482_v26 = vunpack.c.h.bf16 %v1146_v24  ;;  %v1489_v32 = vunpack.c.l.bf16 %v1150_v28  ;;  %v1491_v33 = vunpack.c.h.bf16 %v1150_v28  ;;  %v1158_v47 = vld [vmem:[#allocation2 + $0x18] sm:$0xff]   ;;  %s1325_s5 = smov 8  }
  0x20   :  { %s217_s11 = sld [smem:[#allocation5]]  ;;  %v1511_v44 = vunpack.c.l.bf16 %v1154_v35  ;;  %v1513_v45 = vunpack.c.h.bf16 %v1154_v35  ;;  %v1525_v58 = vunpack.c.l.bf16 %v1158_v47  ;;  %v1527_v59 = vunpack.c.h.bf16 %v1158_v47 }
  0x21   :  { %s1107_s2 = sld [smem:[#allocation5 + $0x1]] }
  0x22   :  { %s1476_s25 = sld [smem:[#allocation5 + $0x80]] }
  0x23   :  { %v127_v0 = vld [vmem:[%s1717_s29] sm:$0xf]  ;;  %s1108_s27 = sld [smem:[#allocation5 + $0x81]] }
  0x24   :  { %v124_v1 = vld [vmem:[%s1718_s17] sm:$0xff]  ;;  %v134_v2 = vsel %vm132_vm0, %v127_v0, 0  ;;  %v125_v3 = vld [vmem:[%s1718_s17 + $0x8] sm:$0xff]  ;;  %s1478_s26 = sld [smem:[#allocation5 + $0x100]] }
  0x25   :  { %143 = vmatpush.bf16.msra.mxu0 %v134_v2  ;;  %v126_v4 = vpack.c.bf16 %v125_v3, %v124_v1  ;;  %v1141_v5 = vld [vmem:[%s1719_s23] sm:$0xff]  ;;  %s1484_s3 = sld [smem:[#allocation5 + $0x101]] }
  0x26   :  { %170 = vmatpush.bf16.msra.mxu1 %v1141_v5  ;;  %v222_v27 = vstv %s217_s11  ;;  %s1486_s28 = sld [smem:[#allocation5 + $0x180]] }
  0x27   :  { %v335_v30 = vstv %s1107_s2  ;;  %v223_v31 = vmul.f32 %v1480_v25, %v222_v27  ;;  %s1720_s4 = sld [smem:[#allocation14_spill]]  ;;  %v224_v39 = vmul.f32 %v1482_v26, %v222_v27 }
  0x28   :  { %1097 = vmatmul.msk.bf16.vlgmr.msra.gmra.mxu0 %vm128_vm1, %v126_v4  ;;  %v233_v34 = vstv %s1476_s25  ;;  %v336_v36 = vmul.f32 %v1480_v25, %v335_v30  ;;  %v337_v37 = vmul.f32 %v1482_v26, %v335_v30  ;;  %s1502_s17 = sld [smem:[#allocation5 + $0x181]] }
  0x29   :  { %v341_v40 = vstv %s1108_s27  ;;  %v234_v43 = vmul.f32 %v1489_v32, %v233_v34  ;;  %v235_v52 = vmul.f32 %v1491_v33, %v233_v34  ;;  %s1127_s29 = sld [smem:[#allocation6 + $0x81]] }
  0x2a   :  { %v244_v42 = vstv %s1478_s26  ;;  %v342_v48 = vmul.f32 %v1489_v32, %v341_v40  ;;  %v343_v49 = vmul.f32 %v1491_v33, %v341_v40  ;;  %s1588_s0 = sld [smem:[#allocation6 + $0x100]] }
  0x2b   :  { %v347_v53 = vstv %s1484_s3  ;;  %v245_v57 = vmul.f32 %v1511_v44, %v244_v42  ;;  %v246_v1 = vmul.f32 %v1513_v45, %v244_v42  ;;  %s1138_s11 = sld [smem:[#allocation8 + $0x100]] }
  0x2c   :  { %v255_v55 = vstv %s1486_s28  ;;  %v348_v61 = vmul.f32 %v1511_v44, %v347_v53  ;;  %v349_v62 = vmul.f32 %v1513_v45, %v347_v53  ;;  %s1122_s28 = sld [smem:[#allocation6 + $0x80]] }
  0x2d   :  { %v1499_v38 = vld [vmem:[%s1720_s4] sm:$0xff]  ;;  %v1507_v41 = vld [vmem:[%s1720_s4 + $0x8] sm:$0xff]  ;;  %v256_v4 = vmul.f32 %v1525_v58, %v255_v55  ;;  %s1124_s4 = sld [smem:[#allocation6 + $0x180]] }
  0x2e   :  { %v225_v46 = vadd.f32 %v223_v31, %v1499_v38  ;;  %v338_v50 = vadd.f32 %v336_v36, %v1499_v38  ;;  %v339_v51 = vadd.f32 %v337_v37, %v1507_v41  ;;  %v226_v54 = vadd.f32 %v224_v39, %v1507_v41  ;;  %s1139_s2 = sld [smem:[#allocation8 + $0x180]] }
  0x2f   :  { %v353_v2 = vstv %s1502_s17 }
  0x30   :  { %v236_v60 = vadd.f32 %v234_v43, %v225_v46  ;;  %v344_v63 = vadd.f32 %v342_v48, %v338_v50  ;;  %v345_v0 = vadd.f32 %v343_v49, %v339_v51  ;;  %v237_v3 = vadd.f32 %v235_v52, %v226_v54 }
  0x32   :  { %v247_v5 = vadd.f32 %v245_v57, %v236_v60 }
  0xa5   :  { %v145_v7 = vpop.f32.mrf.mxu0 }
  0xa6   :  { %v291_v8 = vpack.c.bf16 %v145_v7, %v145_v7 }
  0xa8   :  { %v295_v12 = vunpack.c.l.b16 %v291_v8  ;;  %v355_v8 = vmul.f32 %v1527_v59, %v353_v2 }
  0xad   :  { %v147_v9 = vpop.f32.mrf.mxu0 }
  0xae   :  { %v150_v10 = vpack.c.bf16 %v147_v9, %v145_v7  ;;  %v292_v11 = vpack.c.bf16 %v147_v9, %v147_v9  ;;  %v354_v7 = vmul.f32 %v1525_v58, %v353_v2  ;;  %v350_v9 = vadd.f32 %v348_v61, %v344_v63 }
  0xb0   :  { %v296_v13 = vunpack.c.l.b16 %v292_v11  ;;  %1102 = vmatmul.msk.bf16.vlgmr.msra.gmra.mxu1 %vm159_vm2, %v150_v10  ;;  %v351_v10 = vadd.f32 %v349_v62, %v345_v0  ;;  %v257_v11 = vmul.f32 %v1527_v59, %v255_v55 }
  0xb2   :  { %v297_v14 = vpack.c.b16 %v296_v13, %v295_v12  ;;  %v248_v12 = vadd.f32 %v246_v1, %v237_v3 }
  0xb4   :  { %v300_v15 = vsel %vm128_vm1, %v297_v14, 1065369472 }
  0xb5   :  { %313 = vmatpush.bf16.msra.mxu2 %v300_v15 }
 0x12d   :  { %v172_v17 = vpop.f32.mrf.mxu1 }
 0x12e   :  { %359 = vperm.xlu1 %1176, %v172_v17   ;;  %179 = vrot.lane.b32.xlu0 %v172_v17, %s1322_s1 }
 0x135   :  { %v174_v18 = vpop.f32.mrf.mxu1 }
 0x136   :  { %363 = vperm.xlu1 %1176, %v174_v18   ;;  %181 = vrot.lane.b32.xlu0 %v174_v18, %s1322_s1 }
 0x13e   :  { %1178 = vset.pattern.permute.xlu1 %v1321_v16  ;;  %261 = vperm.xlu0 %1177, %v172_v17   ;;  %v356_v17 = vadd.f32 %v354_v7, %v350_v9  ;;  %v1324_v7 = vmov 8  }
 0x13f   :  { %265 = vperm.xlu1 %1178, %v174_v18   ;;  %v357_v18 = vadd.f32 %v355_v8, %v351_v10 }
 0x146   :  { %389 = vrot.lane.b32.xlu0 %v297_v14, %s1323_s24  ;;  %v258_v14 = vadd.f32 %v256_v4, %v247_v5 }
 0x147   :  { %1179 = vset.pattern.permute.xlu1 %v1324_v7  ;;  %1180 = vset.pattern.permute.xlu0 %v1324_v7 }
 0x1a0   :  { %v180_v19 = vpop.permute.xlu0 %179  ;;  %v360_v29 = vpop.permute.xlu1 %359 }
 0x1a1   :  { %185 = vxpose.xlu2.b32.start [1/2] (short) (narrow) %v180_v19, 8 }
 0x1a8   :  { %v182_v20 = vpop.permute.xlu0 %181  ;;  %v364_v56 = vpop.permute.xlu1 %363 }
 0x1a9   :  { %186 = vxpose.xlu2.b32.end [2/2] (short) (narrow) %v182_v20, 8 }
 0x1b0   :  { %v1472_v21 = vpop.permute.xlu0 %261 }
 0x1b1   :  { %v266_v20 = vpop.permute.xlu1 %265 }
 0x1b8   :  { %v390_v22 = vpop.permute.xlu0 %389 }
 0x1b9   :  { %v392_v23 = vsel %vm128_vm1, %v390_v22, 1065369472  ;;  %v259_v22 = vadd.f32 %v257_v11, %v248_v12 }
 0x1ba   :  { %405 = vmatpush.bf16.msra.mxu3 %v392_v23 }
 0x20b   :  { %1184 = vset.pattern.permute.xlu2 %v1321_v16 }
 0x23a   :  { %v201_v13 = vpop.trf.xlu2 }
 0x23b   :  { %v268_v15 = vperm.slane %v201_v13, 0  ;;  %v366_v19 = vperm.slane %v201_v13, 1 }
 0x23d   :  { %v269_v23 = vadd.f32 %v268_v15, %v1472_v21  ;;  %v270_v24 = vadd.f32 %v268_v15, %v266_v20  ;;  %v367_v27 = vadd.f32 %v366_v19, %v360_v29  ;;  %v368_v28 = vadd.f32 %v366_v19, %v364_v56 }
 0x23f   :  { %v271_v30 = vadd.f32 %v269_v23, %v258_v14  ;;  %v369_v31 = vadd.f32 %v367_v27, %v356_v17  ;;  %v370_v34 = vadd.f32 %v368_v28, %v357_v18  ;;  %v272_v35 = vadd.f32 %v270_v24, %v259_v22 }
 0x240   :  { %v1326_v24 = vmov 16.0  }
 0x241   :  { %vm372_vm3 = vcmp.ge.f32.partialorder %v370_v34, 0.0  ;;  %v374_v36 = vmul.f32 0.2, %v370_v34  ;;  %vm371_vm4 = vcmp.ge.f32.partialorder %v369_v31, 0.0  ;;  %v373_v37 = vmul.f32 0.2, %v369_v31 }
 0x242   :  { %vm273_vm5 = vcmp.ge.f32.partialorder %v271_v30, 0.0  ;;  %v275_v39 = vmul.f32 0.2, %v271_v30  ;;  %v276_v47 = vmul.f32 0.2, %v272_v35  ;;  %vm274_vm6 = vcmp.ge.f32.partialorder %v272_v35, 0.0 }
 0x243   :  { %v376_v40 = vsel %vm372_vm3, %v370_v34, %v374_v36  ;;  %v375_v42 = vsel %vm371_vm4, %v369_v31, %v373_v37 }
 0x244   :  { %v380_v43 = vsel %vm159_vm2, %v376_v40, -inf  ;;  %v377_v46 = vsel %vm159_vm2, %v375_v42, -inf  ;;  %v277_v21 = vsel %vm273_vm5, %v271_v30, %v275_v39  ;;  %v278_v48 = vsel %vm274_vm6, %v272_v35, %v276_v47  ;;  %v1191_v30 = vld [vmem:[%s1689_s6] ss:$0 sm:$0xff]  ;;  %s1137_s6 = sld [smem:[#allocation8 + $0x80]] }
 0x245   :  { %381 = vmax.xlane.f32.xlu1 %v380_v43  ;;  %378 = vmax.xlane.f32.xlu2 %v377_v46  ;;  %v279_v29 = vsel %vm159_vm2, %v277_v21, -inf  ;;  %v282_v49 = vsel %vm159_vm2, %v278_v48, -inf }
 0x246   :  { %280 = vmax.xlane.f32.xlu0 %v279_v29 }
 0x24d   :  { %283 = vmax.xlane.f32.xlu1 %v282_v49 }
 0x2b8   :  { %v382_v50 = vpop.xlane.xlu1 %381  ;;  %v379_v51 = vpop.xlane.xlu2 %378 }
 0x2b9   :  { %v384_v52 = vsub.f32 %v376_v40, %v382_v50  ;;  %v383_v53 = vsub.f32 %v375_v42, %v379_v51  ;;  %v281_v54 = vpop.xlane.xlu0 %280 }
 0x2ba   :  { %v285_v57 = vsub.f32 %v277_v21, %v281_v54 }
 0x2bb   :  { %v387_v55 = vmul.f32 1.442695, %v384_v52  ;;  %v385_v56 = vmul.f32 1.442695, %v383_v53 }
 0x2bc   :  { %v287_v60 = vmul.f32 1.442695, %v285_v57 }
 0x2bd   :  { %1200 = vpow2.f32 %v387_v55 }
 0x2be   :  { %1202 = vpow2.f32 %v385_v56 }
 0x2bf   :  { %1204 = vpow2.f32 %v287_v60 }
 0x2c0   :  { %v284_v61 = vpop.xlane.xlu1 %283 }
 0x2c1   :  { %v286_v62 = vsub.f32 %v278_v48, %v284_v61 }
 0x2c3   :  { %v1201_v63 = vpop.eup %1200  ;;  %v289_v0 = vmul.f32 1.442695, %v286_v62 }
 0x2c4   :  { %v1203_v1 = vpop.eup %1202 }
 0x2c5   :  { %1206 = vpow2.f32 %v289_v0  ;;  %v394_v2 = vpack.c.bf16 %v1201_v63, %v1203_v1  ;;  %v1205_v3 = vpop.eup %1204 }
 0x2c7   :  { %1111 = vmatmul.msk.bf16.vlgmr.msra.gmra.mxu3 %vm159_vm2, %v394_v2 }
 0x2cb   :  { %v1207_v4 = vpop.eup %1206 }
 0x2cc   :  { %v302_v5 = vpack.c.bf16 %v1207_v4, %v1205_v3  ;;  %v1142_v4 = vld [vmem:[%s1692_s9] sm:$0xff] }
 0x2cd   :  { %519 = vmatpush.bf16.msrb.mxu0 %v1142_v4 }
 0x2ce   :  { %1106 = vmatmul.msk.bf16.vlgmr.msra.gmra.mxu2 %vm159_vm2, %v302_v5 }
 0x34a   :  { %v407_v8 = vpop.f32.mrf.mxu3 }
 0x34b   :  { %1208 = vrcp.f32 %v407_v8 }
 0x351   :  { %v1209_v9 = vpop.eup %1208  ;;  %v315_v10 = vpop.f32.mrf.mxu2 }
 0x352   :  { %416 = vperm.xlu1 %1179, %v1209_v9   ;;  %1210 = vrcp.f32 %v315_v10  ;;  %v409_v11 = vpop.f32.mrf.mxu3  ;;  %v876_v9 = vld [vmem:[%s1699_s16] sm:$0xf] }
 0x353   :  { %1212 = vrcp.f32 %v409_v11 }
 0x358   :  { %v1211_v12 = vpop.eup %1210 }
 0x359   :  { %v1213_v13 = vpop.eup %1212  ;;  %v317_v14 = vpop.f32.mrf.mxu2 }
 0x35a   :  { %421 = vperm.xlu0 %1180, %v1213_v13   ;;  %324 = vperm.xlu1 %1179, %v1211_v12   ;;  %1214 = vrcp.f32 %v317_v14  ;;  %v1143_v13 = vld [vmem:[%s1693_s10] sm:$0xff] }
 0x35b   :  { %1216 = vrcp.f32 %v1326_v24  ;;  %545 = vmatpush.bf16.msrb.mxu1 %v1143_v13 }
 0x360   :  { %v1215_v15 = vpop.eup %1214 }
 0x362   :  { %329 = vperm.xlu1 %1179, %v1215_v15   ;;  %1181 = vset.pattern.permute.xlu0 %v1320_v6 }
 0x36a   :  { %1183 = vset.pattern.permute.xlu1 %v1320_v6  ;;  %v1217_v6 = vpop.eup %1216 }
 0x36b   :  { %v452_v36 = vmul.f32 16.0, %v1217_v6  ;;  %vm456_vm7 = vweird.f32 %v1217_v6 }
 0x36d   :  { %v453_v43 = vsub.f32 1.0, %v452_v36 }
 0x36f   :  { %v454_v47 = vmul.f32 %v1217_v6, %v453_v43 }
 0x371   :  { %v455_v50 = vadd.f32 %v1217_v6, %v454_v47 }
 0x373   :  { %v1557_v53 = vsel %vm456_vm7, %v1217_v6, %v455_v50 }
 0x3c4   :  { %v417_v17 = vpop.permute.xlu1 %416 }
 0x3c5   :  { %v424_v18 = vmul.f32 %v417_v17, %v407_v8 }
 0x3c7   :  { %428 = vrot.lane.b32.xlu1 %v424_v18, %s1325_s5 }
 0x3cc   :  { %v422_v19 = vpop.permute.xlu0 %421  ;;  %v325_v22 = vpop.permute.xlu1 %324 }
 0x3cd   :  { %v425_v20 = vmul.f32 %v422_v19, %v409_v11  ;;  %v332_v28 = vmul.f32 %v325_v22, %v315_v10  ;;  %v886_v11 = vsel %vm132_vm0, %v876_v9, 0 }
 0x3ce   :  { %895 = vmatpush.bf16.msra.mxu1 %v886_v11 }
 0x3cf   :  { %430 = vrot.lane.b32.xlu0 %v425_v20, %s1325_s5 }
 0x3d4   :  { %v330_v23 = vpop.permute.xlu1 %329 }
 0x3d5   :  { %v333_v34 = vmul.f32 %v330_v23, %v317_v14  ;;  %v1192_v23 = vld [vmem:[%s1690_s7] ss:$0 sm:$0xff]  ;;  %s1126_s7 = sld [smem:[#allocation6 + $0x1]] }
 0x439   :  { %v429_v27 = vpop.permute.xlu1 %428 }
 0x43a   :  { %v434_v31 = vsel %vm128_vm1, %v332_v28, %v429_v27 }
 0x43b   :  { %v440_v35 = vadd.f32 %v1191_v30, %v434_v31 }
 0x43d   :  { %v442_v42 = vsel %vm159_vm2, %v440_v35, 0.0 }
 0x441   :  { %v431_v37 = vpop.permute.xlu0 %430 }
 0x442   :  { %v435_v39 = vsel %vm128_vm1, %v333_v34, %v431_v37 }
 0x443   :  { %v441_v40 = vadd.f32 %v1191_v30, %v435_v39  ;;  %v1193_v30 = vld [vmem:[%s1691_s8] ss:$0 sm:$0xff]  ;;  %s592_s8 = sld [smem:[#allocation6]] }
 0x445   :  { %v443_v46 = vsel %vm159_vm2, %v441_v40, 0.0 }
 0x446   :  { %v444_v21 = vadd.f32 %v443_v46, %v442_v42 }
 0x448   :  { %v445_v29 = vrot.slane %v444_v21, 4 }
 0x44a   :  { %v446_v48 = vadd.f32 %v445_v29, %v444_v21 }
 0x44c   :  { %v447_v49 = vrot.slane %v446_v48, 2 }
 0x44e   :  { %v448_v51 = vadd.f32 %v447_v49, %v446_v48 }
 0x450   :  { %v449_v52 = vrot.slane %v448_v51, 1 }
 0x452   :  { %v450_v54 = vadd.f32 %v449_v52, %v448_v51 }
 0x454   :  { %v458_v55 = vmul.f32 %v1557_v53, %v450_v54 }
 0x456   :  { %v459_v56 = vsub.f32 %v440_v35, %v458_v55  ;;  %v460_v57 = vsub.f32 %v441_v40, %v458_v55  ;;  %v690_v55 = vstv %s1126_s7  ;;  %s1721_s7 = sld [smem:[#allocation18_spill]] }
 0x458   :  { %v461_v60 = vmul.f32 %v459_v56, %v459_v56  ;;  %v462_v61 = vmul.f32 %v460_v57, %v460_v57 }
 0x45a   :  { %v463_v62 = vsel %vm159_vm2, %v461_v60, 0.0  ;;  %v464_v63 = vsel %vm159_vm2, %v462_v61, 0.0  ;;  %v691_v60 = vmul.f32 %v1480_v25, %v690_v55  ;;  %v692_v61 = vmul.f32 %v1482_v26, %v690_v55 }
 0x45b   :  { %v465_v0 = vadd.f32 %v464_v63, %v463_v62 }
 0x45c   :  { %v694_v4 = vadd.f32 %v692_v61, %v1507_v41 }
 0x45d   :  { %v466_v1 = vrot.slane %v465_v0, 4 }
 0x45f   :  { %v467_v2 = vadd.f32 %v466_v1, %v465_v0  ;;  %v696_v0 = vstv %s1127_s29 }
 0x461   :  { %v468_v3 = vrot.slane %v467_v2, 2 }
 0x463   :  { %v469_v5 = vadd.f32 %v468_v3, %v467_v2  ;;  %v605_v2 = vstv %s1588_s0  ;;  %v693_v3 = vadd.f32 %v691_v60, %v1499_v38 }
 0x465   :  { %v470_v8 = vrot.slane %v469_v5, 1 }
 0x467   :  { %v471_v10 = vadd.f32 %v470_v8, %v469_v5  ;;  %v697_v5 = vmul.f32 %v1489_v32, %v696_v0  ;;  %v698_v8 = vmul.f32 %v1491_v33, %v696_v0 }
 0x469   :  { %v472_v12 = vmul.f32 %v471_v10, %v1557_v53 }
 0x46b   :  { %v473_v14 = vadd.f32 1e-05, %v472_v12 }
 0x46d   :  { %1218 = vrsqrt.f32 %v473_v14  ;;  %vm480_vm9 = vweird.f32 %v473_v14 }
 0x473   :  { %v1219_v15 = vpop.eup %1218 }
 0x474   :  { %v475_v17 = vmul.f32 %v1219_v15, %v473_v14  ;;  %vm481_vm8 = vweird.f32 %v1219_v15 }
 0x475   :  { %vm482_vm10 = vmor %vm480_vm9, %vm481_vm8 }
 0x476   :  { %v476_v18 = vmul.f32 %v1219_v15, %v475_v17  ;;  %v699_v17 = vadd.f32 %v697_v5, %v693_v3 }
 0x478   :  { %v477_v19 = vmul.f32 0.5, %v476_v18  ;;  %v700_v18 = vadd.f32 %v698_v8, %v694_v4 }
 0x47a   :  { %v478_v20 = vsub.f32 1.5, %v477_v19 }
 0x47c   :  { %v479_v22 = vmul.f32 %v1219_v15, %v478_v20 }
 0x47e   :  { %v483_v24 = vsel %vm482_vm10, %v1219_v15, %v479_v22  ;;  %v606_v15 = vmul.f32 %v1511_v44, %v605_v2 }
 0x47f   :  { %v484_v27 = vmul.f32 %v483_v24, %v459_v56  ;;  %v485_v28 = vmul.f32 %v483_v24, %v460_v57  ;;  %v593_v56 = vstv %s592_s8  ;;  %v599_v57 = vstv %s1122_s28 }
 0x480   :  { %v594_v62 = vmul.f32 %v1480_v25, %v593_v56  ;;  %v595_v63 = vmul.f32 %v1482_v26, %v593_v56  ;;  %v600_v1 = vmul.f32 %v1489_v32, %v599_v57  ;;  %v601_v11 = vmul.f32 %v1491_v33, %v599_v57 }
 0x481   :  { %v490_v6 = vmul.f32 %v1192_v23, %v484_v27  ;;  %v491_v31 = vmul.f32 %v1192_v23, %v485_v28  ;;  %v607_v24 = vmul.f32 %v1513_v45, %v605_v2  ;;  %v611_v28 = vstv %s1124_s4 }
 0x482   :  { %v596_v9 = vadd.f32 %v594_v62, %v1499_v38  ;;  %v597_v10 = vadd.f32 %v595_v63, %v1507_v41 }
 0x483   :  { %v496_v34 = vadd.f32 %v1193_v30, %v490_v6  ;;  %v497_v35 = vadd.f32 %v1193_v30, %v491_v31 }
 0x484   :  { %v602_v22 = vadd.f32 %v600_v1, %v596_v9  ;;  %v603_v23 = vadd.f32 %v601_v11, %v597_v10 }
 0x485   :  { %v498_v36 = vmax.f32 %v496_v34, 0.0  ;;  %v499_v37 = vmax.f32 %v497_v35, 0.0 }
 0x486   :  { %v608_v35 = vadd.f32 %v606_v15, %v602_v22 }
 0x487   :  { %v500_v39 = vpack.c.bf16 %v499_v37, %v498_v36  ;;  %v609_v36 = vadd.f32 %v607_v24, %v603_v23  ;;  %v612_v37 = vmul.f32 %v1525_v58, %v611_v28 }
 0x489   :  { %1116 = vmatmul.msk.bf16.vlgmr.msrb.gmra.mxu0 %vm159_vm2, %v500_v39  ;;  %v613_v39 = vmul.f32 %v1527_v59, %v611_v28 }
 0x506   :  { %v521_v40 = vpop.f32.mrf.mxu0 }
 0x507   :  { %v647_v42 = vpack.c.bf16 %v521_v40, %v521_v40 }
 0x509   :  { %v651_v29 = vunpack.c.l.b16 %v647_v42 }
 0x50e   :  { %v523_v43 = vpop.f32.mrf.mxu0 }
 0x50f   :  { %v526_v46 = vpack.c.bf16 %v523_v43, %v521_v40  ;;  %v648_v21 = vpack.c.bf16 %v523_v43, %v523_v43 }
 0x511   :  { %v652_v47 = vunpack.c.l.b16 %v648_v21  ;;  %1121 = vmatmul.msk.bf16.vlgmr.msrb.gmra.mxu1 %vm159_vm2, %v526_v46 }
 0x513   :  { %v653_v48 = vpack.c.b16 %v652_v47, %v651_v29 }
 0x515   :  { %v655_v49 = vsel %vm128_vm1, %v653_v48, 1065369472 }
 0x516   :  { %668 = vmatpush.bf16.msrb.mxu2 %v655_v49  ;;  %v615_v49 = vadd.f32 %v613_v39, %v609_v36 }
 0x58e   :  { %v547_v50 = vpop.f32.mrf.mxu1 }
 0x58f   :  { %714 = vperm.xlu0 %1181, %v547_v50   ;;  %554 = vrot.lane.b32.xlu1 %v547_v50, %s1322_s1 }
 0x596   :  { %v549_v51 = vpop.f32.mrf.mxu1 }
 0x597   :  { %1182 = vset.pattern.permute.xlu0 %v1321_v16  ;;  %718 = vperm.xlu1 %1183, %v549_v51  }
 0x598   :  { %556 = vrot.lane.b32.xlu2 %v549_v51, %s1322_s1  ;;  %617 = vperm.xlu0 %1182, %v547_v50   ;;  %s1128_s1 = sld [smem:[#allocation6 + $0x101]] }
 0x59e   :  { %v702_v12 = vstv %s1128_s1 }
 0x59f   :  { %v703_v19 = vmul.f32 %v1511_v44, %v702_v12  ;;  %v704_v20 = vmul.f32 %v1513_v45, %v702_v12 }
 0x5a0   :  { %621 = vperm.xlu2 %1184, %v549_v51   ;;  %1186 = vset.pattern.permute.xlu0 %v1324_v7 }
 0x5a1   :  { %v705_v30 = vadd.f32 %v703_v19, %v699_v17  ;;  %v706_v6 = vadd.f32 %v704_v20, %v700_v18 }
 0x5a8   :  { %1185 = vset.pattern.permute.xlu2 %v1324_v7 }
 0x5f2   :  { %v557_v54 = vpop.permute.xlu2 %556 }
 0x5fa   :  { %v622_v29 = vpop.permute.xlu2 %621 }
 0x601   :  { %v555_v52 = vpop.permute.xlu1 %554  ;;  %v715_v13 = vpop.permute.xlu0 %714 }
 0x602   :  { %560 = vxpose.xlu1.b32.start [1/2] (short) (narrow) %v555_v52, 8 }
 0x609   :  { %v719_v14 = vpop.permute.xlu1 %718 }
 0x60a   :  { %561 = vxpose.xlu1.b32.end [2/2] (short) (narrow) %v557_v54, 8  ;;  %v618_v47 = vpop.permute.xlu0 %617 }
 0x664   :  { %744 = vrot.lane.b32.xlu1 %v653_v48, %s1323_s24  ;;  %s1129_s24 = sld [smem:[#allocation6 + $0x181]]  ;;  %v614_v48 = vadd.f32 %v612_v37, %v608_v35 }
 0x66a   :  { %v708_v27 = vstv %s1129_s24 }
 0x66b   :  { %v709_v31 = vmul.f32 %v1525_v58, %v708_v27  ;;  %v710_v34 = vmul.f32 %v1527_v59, %v708_v27 }
 0x66d   :  { %v711_v42 = vadd.f32 %v709_v31, %v705_v30  ;;  %v712_v43 = vadd.f32 %v710_v34, %v706_v6 }
 0x6a6   :  { %v576_v40 = vpop.trf.xlu1 }
 0x6a7   :  { %v624_v46 = vperm.slane %v576_v40, 0  ;;  %v721_v21 = vperm.slane %v576_v40, 1 }
 0x6a9   :  { %v625_v50 = vadd.f32 %v624_v46, %v618_v47  ;;  %v626_v51 = vadd.f32 %v624_v46, %v622_v29  ;;  %v722_v52 = vadd.f32 %v721_v21, %v715_v13  ;;  %v723_v54 = vadd.f32 %v721_v21, %v719_v14 }
 0x6ab   :  { %v724_v55 = vadd.f32 %v722_v52, %v711_v42  ;;  %v725_v56 = vadd.f32 %v723_v54, %v712_v43  ;;  %v627_v57 = vadd.f32 %v625_v50, %v614_v48  ;;  %v628_v60 = vadd.f32 %v626_v51, %v615_v49 }
 0x6ad   :  { %vm727_vm11 = vcmp.ge.f32.partialorder %v725_v56, 0.0  ;;  %v729_v61 = vmul.f32 0.2, %v725_v56  ;;  %vm726_vm12 = vcmp.ge.f32.partialorder %v724_v55, 0.0  ;;  %v728_v62 = vmul.f32 0.2, %v724_v55 }
 0x6ae   :  { %v631_v3 = vmul.f32 0.2, %v627_v57  ;;  %v632_v4 = vmul.f32 0.2, %v628_v60  ;;  %vm629_vm13 = vcmp.ge.f32.partialorder %v627_v57, 0.0  ;;  %vm630_vm14 = vcmp.ge.f32.partialorder %v628_v60, 0.0 }
 0x6af   :  { %v731_v63 = vsel %vm727_vm11, %v725_v56, %v729_v61  ;;  %v730_v0 = vsel %vm726_vm12, %v724_v55, %v728_v62  ;;  %v1194_v56 = vld [vmem:[%s1695_s12] ss:$0 sm:$0xff] }
 0x6b0   :  { %v735_v1 = vsel %vm159_vm2, %v731_v63, -inf  ;;  %v732_v2 = vsel %vm159_vm2, %v730_v0, -inf  ;;  %v633_v5 = vsel %vm629_vm13, %v627_v57, %v631_v3  ;;  %v634_v8 = vsel %vm630_vm14, %v628_v60, %v632_v4 }
 0x6b1   :  { %736 = vmax.xlane.f32.xlu0 %v735_v1  ;;  %733 = vmax.xlane.f32.xlu2 %v732_v2  ;;  %v635_v9 = vsel %vm159_vm2, %v633_v5, -inf  ;;  %v638_v10 = vsel %vm159_vm2, %v634_v8, -inf }
 0x6b9   :  { %636 = vmax.xlane.f32.xlu2 %v635_v9  ;;  %639 = vmax.xlane.f32.xlu0 %v638_v10 }
 0x6d6   :  { %v745_v11 = vpop.permute.xlu1 %744 }
 0x6d7   :  { %v747_v12 = vsel %vm128_vm1, %v745_v11, 1065369472 }
 0x6d8   :  { %760 = vmatpush.bf16.msrb.mxu3 %v747_v12 }
 0x724   :  { %v737_v13 = vpop.xlane.xlu0 %736  ;;  %v734_v14 = vpop.xlane.xlu2 %733 }
 0x725   :  { %v739_v15 = vsub.f32 %v731_v63, %v737_v13  ;;  %v738_v17 = vsub.f32 %v730_v0, %v734_v14 }
 0x727   :  { %v742_v18 = vmul.f32 1.442695, %v739_v15  ;;  %v740_v19 = vmul.f32 1.442695, %v738_v17 }
 0x729   :  { %1220 = vpow2.f32 %v742_v18 }
 0x72a   :  { %1222 = vpow2.f32 %v740_v19 }
 0x72c   :  { %v640_v20 = vpop.xlane.xlu0 %639  ;;  %v637_v22 = vpop.xlane.xlu2 %636 }
 0x72d   :  { %v642_v23 = vsub.f32 %v634_v8, %v640_v20  ;;  %v641_v24 = vsub.f32 %v633_v5, %v637_v22 }
 0x72f   :  { %v1221_v27 = vpop.eup %1220  ;;  %v645_v28 = vmul.f32 1.442695, %v642_v23  ;;  %v643_v30 = vmul.f32 1.442695, %v641_v24 }
 0x730   :  { %v1223_v6 = vpop.eup %1222 }
 0x731   :  { %1224 = vpow2.f32 %v645_v28  ;;  %v749_v31 = vpack.c.bf16 %v1221_v27, %v1223_v6  ;;  %v1144_v27 = vld [vmem:[%s1698_s15] sm:$0xff] }
 0x732   :  { %1226 = vpow2.f32 %v643_v30  ;;  %867 = vmatpush.bf16.msra.mxu0 %v1144_v27 }
 0x733   :  { %1130 = vmatmul.msk.bf16.vlgmr.msrb.gmra.mxu3 %vm159_vm2, %v749_v31 }
 0x737   :  { %v1225_v34 = vpop.eup %1224 }
 0x738   :  { %v1227_v35 = vpop.eup %1226 }
 0x739   :  { %v657_v36 = vpack.c.bf16 %v1225_v34, %v1227_v35 }
 0x73b   :  { %1125 = vmatmul.msk.bf16.vlgmr.msrb.gmra.mxu2 %vm159_vm2, %v657_v36 }
 0x7b6   :  { %v762_v37 = vpop.f32.mrf.mxu3 }
 0x7b7   :  { %1228 = vrcp.f32 %v762_v37 }
 0x7bd   :  { %v1229_v39 = vpop.eup %1228 }
 0x7be   :  { %771 = vperm.xlu2 %1185, %v1229_v39   ;;  %v670_v40 = vpop.f32.mrf.mxu2  ;;  %v764_v42 = vpop.f32.mrf.mxu3 }
 0x7bf   :  { %1230 = vrcp.f32 %v670_v40 }
 0x7c0   :  { %1232 = vrcp.f32 %v764_v42 }
 0x7c5   :  { %v1231_v43 = vpop.eup %1230 }
 0x7c6   :  { %v1233_v46 = vpop.eup %1232  ;;  %679 = vperm.xlu2 %1185, %v1231_v43   ;;  %v672_v21 = vpop.f32.mrf.mxu2 }
 0x7c7   :  { %776 = vperm.xlu0 %1186, %v1233_v46   ;;  %1234 = vrcp.f32 %v672_v21  ;;  %v1196_v46 = vld [vmem:[%s1697_s14] ss:$0 sm:$0xff]  ;;  %s942_s14 = sld [smem:[#allocation8]] }
 0x7cd   :  { %v1235_v29 = vpop.eup %1234 }
 0x7ce   :  { %684 = vperm.xlu2 %1185, %v1235_v29  }
 0x7cf   :  { %1188 = vset.pattern.permute.xlu0 %v1321_v16 }
 0x7d6   :  { %1187 = vset.pattern.permute.xlu2 %v1321_v16 }
 0x818   :  { %v772_v47 = vpop.permute.xlu2 %771 }
 0x819   :  { %v779_v48 = vmul.f32 %v772_v47, %v762_v37 }
 0x81b   :  { %783 = vrot.lane.b32.xlu2 %v779_v48, %s1325_s5 }
 0x820   :  { %v680_v51 = vpop.permute.xlu2 %679 }
 0x821   :  { %v687_v55 = vmul.f32 %v680_v51, %v670_v40 }
 0x828   :  { %v685_v52 = vpop.permute.xlu2 %684 }
 0x829   :  { %v688_v60 = vmul.f32 %v685_v52, %v672_v21 }
 0x839   :  { %v777_v49 = vpop.permute.xlu0 %776 }
 0x83a   :  { %v780_v50 = vmul.f32 %v777_v49, %v764_v42  ;;  %v1195_v42 = vld [vmem:[%s1696_s13] ss:$0 sm:$0xff]  ;;  %s1327_s13 = smov 127  }
 0x83c   :  { %785 = vrot.lane.b32.xlu0 %v780_v50, %s1325_s5 }
 0x875   :  { %v784_v54 = vpop.permute.xlu2 %783 }
 0x876   :  { %v789_v57 = vsel %vm128_vm1, %v687_v55, %v784_v54 }
 0x877   :  { %v795_v16 = vadd.f32 %v1194_v56, %v789_v57 }
 0x879   :  { %v797_v0 = vsel %vm159_vm2, %v795_v16, 0.0 }
 0x8ae   :  { %v786_v61 = vpop.permute.xlu0 %785 }
 0x8af   :  { %v790_v62 = vsel %vm128_vm1, %v688_v60, %v786_v61 }
 0x8b0   :  { %v796_v63 = vadd.f32 %v1194_v56, %v790_v62 }
 0x8b2   :  { %v798_v1 = vsel %vm159_vm2, %v796_v63, 0.0 }
 0x8b3   :  { %v799_v2 = vadd.f32 %v798_v1, %v797_v0 }
 0x8b5   :  { %v800_v3 = vrot.slane %v799_v2, 4 }
 0x8b7   :  { %v801_v4 = vadd.f32 %v800_v3, %v799_v2 }
 0x8b9   :  { %v802_v5 = vrot.slane %v801_v4, 2 }
 0x8bb   :  { %v803_v8 = vadd.f32 %v802_v5, %v801_v4  ;;  %v943_v4 = vstv %s942_s14 }
 0x8bc   :  { %v944_v5 = vmul.f32 %v1480_v25, %v943_v4 }
 0x8bd   :  { %v804_v9 = vrot.slane %v803_v8, 1 }
 0x8bf   :  { %v805_v10 = vadd.f32 %v804_v9, %v803_v8  ;;  %v945_v8 = vmul.f32 %v1482_v26, %v943_v4  ;;  %v949_v9 = vstv %s1137_s6 }
 0x8c1   :  { %v806_v11 = vmul.f32 %v805_v10, %v1557_v53  ;;  %v946_v10 = vadd.f32 %v944_v5, %v1499_v38 }
 0x8c3   :  { %v807_v12 = vsub.f32 %v795_v16, %v806_v11  ;;  %v808_v13 = vsub.f32 %v796_v63, %v806_v11  ;;  %v947_v11 = vadd.f32 %v945_v8, %v1507_v41 }
 0x8c5   :  { %v809_v14 = vmul.f32 %v807_v12, %v807_v12  ;;  %v810_v15 = vmul.f32 %v808_v13, %v808_v13 }
 0x8c7   :  { %v811_v17 = vsel %vm159_vm2, %v809_v14, 0.0  ;;  %v812_v18 = vsel %vm159_vm2, %v810_v15, 0.0  ;;  %v955_v14 = vstv %s1138_s11 }
 0x8c8   :  { %v813_v19 = vadd.f32 %v812_v18, %v811_v17  ;;  %v956_v18 = vmul.f32 %v1511_v44, %v955_v14  ;;  %v957_v25 = vmul.f32 %v1513_v45, %v955_v14 }
 0x8ca   :  { %v814_v20 = vrot.slane %v813_v19, 4 }
 0x8cc   :  { %v815_v22 = vadd.f32 %v814_v20, %v813_v19  ;;  %v961_v19 = vstv %s1139_s2 }
 0x8cd   :  { %v963_v38 = vmul.f32 %v1527_v59, %v961_v19 }
 0x8ce   :  { %v816_v23 = vrot.slane %v815_v22, 2 }
 0x8d0   :  { %v817_v24 = vadd.f32 %v816_v23, %v815_v22  ;;  %v962_v22 = vmul.f32 %v1525_v58, %v961_v19 }
 0x8d2   :  { %v818_v28 = vrot.slane %v817_v24, 1 }
 0x8d4   :  { %v819_v30 = vadd.f32 %v818_v28, %v817_v24 }
 0x8d6   :  { %v820_v6 = vmul.f32 %v819_v30, %v1557_v53 }
 0x8d8   :  { %v821_v31 = vadd.f32 1e-05, %v820_v6 }
 0x8da   :  { %1236 = vrsqrt.f32 %v821_v31  ;;  %vm828_vm0 = vweird.f32 %v821_v31 }
 0x8e0   :  { %v1237_v34 = vpop.eup %1236 }
 0x8e1   :  { %v823_v35 = vmul.f32 %v1237_v34, %v821_v31  ;;  %vm829_vm15 = vweird.f32 %v1237_v34 }
 0x8e2   :  { %vm830_vm3 = vmor %vm828_vm0, %vm829_vm15 }
 0x8e3   :  { %v824_v36 = vmul.f32 %v1237_v34, %v823_v35 }
 0x8e5   :  { %v825_v37 = vmul.f32 0.5, %v824_v36 }
 0x8e7   :  { %v826_v39 = vsub.f32 1.5, %v825_v37 }
 0x8e9   :  { %v827_v40 = vmul.f32 %v1237_v34, %v826_v39 }
 0x8eb   :  { %v831_v43 = vsel %vm830_vm3, %v1237_v34, %v827_v40 }
 0x8ec   :  { %v832_v21 = vmul.f32 %v831_v43, %v807_v12  ;;  %v833_v29 = vmul.f32 %v831_v43, %v808_v13  ;;  %v950_v12 = vmul.f32 %v1489_v32, %v949_v9  ;;  %v951_v13 = vmul.f32 %v1491_v33, %v949_v9 }
 0x8ee   :  { %v838_v47 = vmul.f32 %v1195_v42, %v832_v21  ;;  %v839_v48 = vmul.f32 %v1195_v42, %v833_v29  ;;  %v952_v15 = vadd.f32 %v950_v12, %v946_v10  ;;  %v953_v17 = vadd.f32 %v951_v13, %v947_v11 }
 0x8f0   :  { %v844_v49 = vadd.f32 %v1196_v46, %v838_v47  ;;  %v845_v50 = vadd.f32 %v1196_v46, %v839_v48  ;;  %v958_v26 = vadd.f32 %v956_v18, %v952_v15  ;;  %v959_v20 = vadd.f32 %v957_v25, %v953_v17 }
 0x8f2   :  { %v846_v51 = vmax.f32 %v844_v49, 0.0  ;;  %v847_v52 = vmax.f32 %v845_v50, 0.0  ;;  %v964_v23 = vadd.f32 %v962_v22, %v958_v26  ;;  %v965_v32 = vadd.f32 %v963_v38, %v959_v20 }
 0x8f4   :  { %v848_v54 = vpack.c.bf16 %v847_v52, %v846_v51  ;;  %v1197_v51 = vld [vmem:[%s1701_s18] ss:$0 sm:$0xff] }
 0x8f6   :  { %1135 = vmatmul.msk.bf16.vlgmr.msra.gmra.mxu0 %vm159_vm2, %v848_v54 }
 0x973   :  { %v869_v55 = vpop.f32.mrf.mxu0 }
 0x974   :  { %v874_v56 = vpack.c.bf16 %v869_v55, %v869_v55 }
 0x976   :  { %v879_v16 = vunpack.c.l.b16 %v874_v56 }
 0x97b   :  { %v871_v57 = vpop.f32.mrf.mxu0 }
 0x97c   :  { %v875_v60 = vpack.c.bf16 %v871_v57, %v871_v57 }
 0x97e   :  { %v880_v61 = vunpack.c.l.b16 %v875_v60 }
 0x980   :  { %v881_v62 = vpack.c.b16 %v880_v61, %v879_v16 }
 0x982   :  { %1136 = vmatmul.msk.bf16.vlgmr.msra.gmra.mxu1 %vm128_vm1, %v881_v62  ;;  %v997_v63 = vsel %vm128_vm1, %v881_v62, 1065369472 }
 0x983   :  { %1010 = vmatpush.bf16.msra.mxu2 %v997_v63 }
 0x9ff   :  { %v897_v0 = vpop.f32.mrf.mxu1 }
 0xa00   :  { %904 = vrot.lane.b32.xlu2 %v897_v0, %s1327_s13 }
 0xa07   :  { %v899_v1 = vpop.f32.mrf.mxu1 }
 0xa08   :  { %967 = vperm.xlu2 %1187, %v897_v0   ;;  %906 = vrot.lane.b32.xlu0 %v899_v1, %s1327_s13 }
 0xa10   :  { %971 = vperm.xlu0 %1188, %v899_v1  }
 0xa18   :  { %1190 = vset.pattern.permute.xlu0 %v1324_v7 }
 0xa5a   :  { %v905_v2 = vpop.permute.xlu2 %904 }
 0xa5b   :  { %910 = vxpose.xlu2.b32.start [1/2] (short) (narrow) %v905_v2, 8 }
 0xa7a   :  { %v907_v3 = vpop.permute.xlu0 %906 }
 0xa7b   :  { %911 = vxpose.xlu2.b32.end [2/2] (short) (narrow) %v907_v3, 8 }
 0xa82   :  { %v972_v33 = vpop.permute.xlu0 %971 }
 0xadd   :  { %1189 = vset.pattern.permute.xlu2 %v1324_v7  ;;  %v968_v7 = vpop.permute.xlu2 %967 }
 0xb0c   :  { %v926_v41 = vpop.trf.xlu2 }
 0xb0d   :  { %v974_v24 = vperm.slane %v926_v41, 0 }
 0xb0f   :  { %v975_v27 = vadd.f32 %v974_v24, %v968_v7  ;;  %v976_v28 = vadd.f32 %v974_v24, %v972_v33  ;;  %v1198_v24 = vld [vmem:[%s1702_s19] ss:$0 sm:$0xff] }
 0xb11   :  { %v977_v30 = vadd.f32 %v975_v27, %v964_v23  ;;  %v978_v6 = vadd.f32 %v976_v28, %v965_v32 }
 0xb13   :  { %vm979_vm4 = vcmp.ge.f32.partialorder %v977_v30, 0.0  ;;  %v981_v44 = vmul.f32 0.2, %v977_v30  ;;  %vm980_vm5 = vcmp.ge.f32.partialorder %v978_v6, 0.0  ;;  %v982_v45 = vmul.f32 0.2, %v978_v6 }
 0xb15   :  { %v983_v31 = vsel %vm979_vm4, %v977_v30, %v981_v44  ;;  %v984_v34 = vsel %vm980_vm5, %v978_v6, %v982_v45 }
 0xb16   :  { %v985_v35 = vsel %vm159_vm2, %v983_v31, -inf  ;;  %v988_v58 = vsel %vm159_vm2, %v984_v34, -inf }
 0xb17   :  { %986 = vmax.xlane.f32.xlu0 %v985_v35  ;;  %989 = vmax.xlane.f32.xlu1 %v988_v58 }
 0xb8a   :  { %v990_v59 = vpop.xlane.xlu1 %989  ;;  %v987_v36 = vpop.xlane.xlu0 %986 }
 0xb8b   :  { %v992_v37 = vsub.f32 %v984_v34, %v990_v59  ;;  %v991_v39 = vsub.f32 %v983_v31, %v987_v36 }
 0xb8d   :  { %v995_v40 = vmul.f32 1.442695, %v992_v37  ;;  %v993_v42 = vmul.f32 1.442695, %v991_v39 }
 0xb8f   :  { %1238 = vpow2.f32 %v995_v40 }
 0xb90   :  { %1240 = vpow2.f32 %v993_v42 }
 0xb95   :  { %v1239_v43 = vpop.eup %1238 }
 0xb96   :  { %v1241_v46 = vpop.eup %1240 }
 0xb97   :  { %v999_v21 = vpack.c.bf16 %v1239_v43, %v1241_v46 }
 0xb99   :  { %1140 = vmatmul.msk.bf16.vlgmr.msra.gmra.mxu2 %vm159_vm2, %v999_v21 }
 0xc1c   :  { %v1012_v29 = vpop.f32.mrf.mxu2 }
 0xc1d   :  { %1242 = vrcp.f32 %v1012_v29 }
 0xc23   :  { %v1243_v47 = vpop.eup %1242 }
 0xc24   :  { %1021 = vperm.xlu2 %1189, %v1243_v47   ;;  %v1014_v48 = vpop.f32.mrf.mxu2 }
 0xc25   :  { %1244 = vrcp.f32 %v1014_v48 }
 0xc2b   :  { %v1245_v49 = vpop.eup %1244 }
 0xc2c   :  { %1026 = vperm.xlu0 %1190, %v1245_v49  }
 0xc7e   :  { %v1022_v50 = vpop.permute.xlu2 %1021 }
 0xc7f   :  { %v1029_v52 = vmul.f32 %v1022_v50, %v1012_v29 }
 0xc81   :  { %v1035_v55 = vadd.f32 %v1197_v51, %v1029_v52 }
 0xc83   :  { %v1037_v60 = vsel %vm128_vm1, %v1035_v55, 0.0 }
 0xc9e   :  { %v1027_v54 = vpop.permute.xlu0 %1026 }
 0xc9f   :  { %v1030_v56 = vmul.f32 %v1027_v54, %v1014_v48 }
 0xca1   :  { %v1036_v57 = vadd.f32 %v1197_v51, %v1030_v56 }
 0xca3   :  { %v1038_v16 = vsel %vm128_vm1, %v1036_v57, 0.0 }
 0xca4   :  { %v1039_v61 = vadd.f32 %v1038_v16, %v1037_v60 }
 0xca6   :  { %v1040_v62 = vrot.slane %v1039_v61, 4 }
 0xca8   :  { %v1041_v63 = vadd.f32 %v1040_v62, %v1039_v61 }
 0xcaa   :  { %v1042_v0 = vrot.slane %v1041_v63, 2 }
 0xcac   :  { %v1043_v1 = vadd.f32 %v1042_v0, %v1041_v63 }
 0xcae   :  { %v1044_v2 = vrot.slane %v1043_v1, 1 }
 0xcb0   :  { %v1045_v3 = vadd.f32 %v1044_v2, %v1043_v1 }
 0xcb2   :  { %v1046_v4 = vmul.f32 %v1045_v3, %v1557_v53 }
 0xcb4   :  { %v1047_v5 = vsub.f32 %v1035_v55, %v1046_v4  ;;  %v1048_v8 = vsub.f32 %v1036_v57, %v1046_v4 }
 0xcb6   :  { %v1049_v9 = vmul.f32 %v1047_v5, %v1047_v5  ;;  %v1050_v10 = vmul.f32 %v1048_v8, %v1048_v8 }
 0xcb8   :  { %v1051_v11 = vsel %vm128_vm1, %v1049_v9, 0.0  ;;  %v1052_v12 = vsel %vm128_vm1, %v1050_v10, 0.0 }
 0xcb9   :  { %v1053_v13 = vadd.f32 %v1052_v12, %v1051_v11 }
 0xcbb   :  { %v1054_v14 = vrot.slane %v1053_v13, 4 }
 0xcbd   :  { %v1055_v7 = vadd.f32 %v1054_v14, %v1053_v13 }
 0xcbf   :  { %v1056_v15 = vrot.slane %v1055_v7, 2 }
 0xcc1   :  { %v1057_v17 = vadd.f32 %v1056_v15, %v1055_v7 }
 0xcc3   :  { %v1058_v18 = vrot.slane %v1057_v17, 1 }
 0xcc5   :  { %v1059_v25 = vadd.f32 %v1058_v18, %v1057_v17 }
 0xcc7   :  { %v1060_v19 = vmul.f32 %v1059_v25, %v1557_v53  ;;  %v1199_v53 = vld [vmem:[%s1703_s20] ss:$0 sm:$0xff] }
 0xcc9   :  { %v1061_v26 = vadd.f32 1e-05, %v1060_v19 }
 0xccb   :  { %1246 = vrsqrt.f32 %v1061_v26  ;;  %vm1068_vm6 = vweird.f32 %v1061_v26 }
 0xcd1   :  { %v1247_v20 = vpop.eup %1246 }
 0xcd2   :  { %v1063_v22 = vmul.f32 %v1247_v20, %v1061_v26  ;;  %vm1069_vm2 = vweird.f32 %v1247_v20 }
 0xcd3   :  { %vm1070_vm7 = vmor %vm1068_vm6, %vm1069_vm2 }
 0xcd4   :  { %v1064_v38 = vmul.f32 %v1247_v20, %v1063_v22 }
 0xcd6   :  { %v1065_v41 = vmul.f32 0.5, %v1064_v38 }
 0xcd8   :  { %v1066_v23 = vsub.f32 1.5, %v1065_v41 }
 0xcda   :  { %v1067_v32 = vmul.f32 %v1247_v20, %v1066_v23 }
 0xcdc   :  { %v1071_v33 = vsel %vm1070_vm7, %v1247_v20, %v1067_v32 }
 0xcdd   :  { %v1072_v27 = vmul.f32 %v1071_v33, %v1047_v5  ;;  %v1073_v28 = vmul.f32 %v1071_v33, %v1048_v8 }
 0xcdf   :  { %v1078_v30 = vmul.f32 %v1198_v24, %v1072_v27  ;;  %v1079_v6 = vmul.f32 %v1198_v24, %v1073_v28 }
 0xce1   :  { %v1084_v44 = vadd.f32 %v1199_v53, %v1078_v30  ;;  %v1085_v45 = vadd.f32 %v1199_v53, %v1079_v6 }
 0xce3   :  { %v1086_v31 = vmax.f32 %v1084_v44, 0.0  ;;  %v1087_v34 = vmax.f32 %v1085_v45, 0.0 }
 0xce5   :  { %1088 = vst.msk [vmem:[%s1721_s7] sm:$0xff] %vm128_vm1, %v1086_v31 }
 0xce6   :  { %1089 = vst.msk [vmem:[%s1721_s7 + $0x8] sm:$0xff] %vm128_vm1, %v1087_v34 }
 0xce7   :  { %1094 = vsyncpa [#allocation3], 1 }
 0xce8   :  { %1095 = vsyncpa [#allocation4], 1 }
 0xce9   :  { %1096 = vsyncpa [#allocation7], 1 }

</bundles_post_ra>
